<compile_context>
chip_gen: v6e
topology: v6e:2x2x1
jax: 0.10.0
libtpu: 0.0.40
codegen_flags: <defaults>
</compile_context>

<pallas_src>
import numpy as np
import jax
import jax.numpy as jnp
from jax.experimental import pallas as pl
from jax.experimental.pallas import tpu as pltpu


# ----------------------------------------------------------------------------
# Pallas kernel: one batch tile (bt, 2, H, W) per grid step.
# ----------------------------------------------------------------------------
def _dc_kernel(x_ref, k_ref, ahr_ref, ahi_ref,
               m1r_ref, m1i_ref, m2r_ref, m2i_ref, o_ref):
    f32 = jnp.float32
    bf16 = jnp.bfloat16
    bt = x_ref.shape[0]

    # Constant operators (bf16, grid-invariant -> fetched once). The Gauss
    # sum/diff companions are built in-kernel: one VPU add/sub per matrix per
    # grid step, hoisted out of the per-element loop.
    ahr = ahr_ref[...]
    ahi = ahi_ref[...]
    ahd = ahr - ahi                     # Gauss matrix for conj(A_H) @ (.)
    m1r = m1r_ref[...]
    m1i = m1i_ref[...]
    m1s = m1r + m1i
    m2r = m2r_ref[...]
    m2i = m2i_ref[...]
    m2s = m2r + m2i

    def dot32(a, b):
        return jnp.dot(a, b, preferred_element_type=f32)

    # bt is a small static constant: plain 2D dots, no broadcasted operands.
    for b in range(bt):
        # ---- T = conj(A_H) @ K_us   (Gauss 3-mult complex matmul) ----------
        kr = k_ref[b, 0]
        ki = k_ref[b, 1]
        t1 = dot32(ahr, kr)
        t2 = dot32(ahi, ki)
        t3 = dot32(ahd, kr + ki)
        tr = (t1 + t2).astype(bf16)            # Re(T) =  ahr@kr + ahi@ki
        ti = (t3 - t1 + t2).astype(bf16)       # Im(T) =  ahr@ki - ahi@kr

        # ---- U1 = T @ M1,  M1 = diag(m) @ conj(B_W) -------------------------
        u1 = dot32(tr, m1r)
        u2 = dot32(ti, m1i)
        u3 = dot32(tr + ti, m1s)
        acc_r = u1 - u2
        acc_i = u3 - u1 - u2

        # ---- U2 = X @ M2,  M2 = B_W @ diag(1-m) @ conj(B_W) -----------------
        xr = x_ref[b, 0]
        xi = x_ref[b, 1]
        v1 = dot32(xr, m2r)
        v2 = dot32(xi, m2i)
        v3 = dot32(xr + xi, m2s)

        # out = U1 + U2 : direct per-channel stores, no stacked temporary.
        o_ref[b, 0] = (acc_r + (v1 - v2)).astype(o_ref.dtype)
        o_ref[b, 1] = (acc_i + (v3 - v1 - v2)).astype(o_ref.dtype)


# ----------------------------------------------------------------------------
# Glue: centered DFT matrices, mask folding, batch tiling, pallas_call.
# ----------------------------------------------------------------------------
def _centered_dft_matrix(n):
    """A such that A @ v == fftshift(fft(ifftshift(v), norm='ortho'))."""
    eye = np.eye(n, dtype=np.complex128)
    return np.fft.fftshift(
        np.fft.fft(np.fft.ifftshift(eye, axes=0), axis=0, norm="ortho"), axes=0)


def _centered_idft_matrix(n):
    eye = np.eye(n, dtype=np.complex128)
    return np.fft.fftshift(
        np.fft.ifft(np.fft.ifftshift(eye, axes=0), axis=0, norm="ortho"), axes=0)


def _vmem_limit_bytes():
    """Per-generation scoped-VMEM budget (~100 MiB on v5e/v6e, ~48 MiB on
    v7x's 64 MiB VMEM), with headroom left for Mosaic-internal scratch."""
    try:
        cap = int(pltpu.get_tpu_info().vmem_capacity_bytes)
    except Exception:
        cap = 64 << 20              # conservative default: safe everywhere
    return min((cap * 3) // 4, 100 << 20)


def _pick_batch_tile(B, H, W, vmem_budget):
    """Fold a few batch elements per grid step only when images are small
    (per-step-overhead amortization) and the *honest* working set fits:
    double-buffered in/out blocks, constant matrices (worst case double
    buffered) and the live f32 temporaries of the unrolled per-element loop.
    Always keeps >= 2 grid steps so both v7x TensorCores get work."""
    const_bytes = (2 * H * H + 4 * W * W) * 2 * 2        # bf16, 2 buffers worst case

    def fits(bt):
        io = 2 * bt * 2 * H * W * (2 + 2 + 4)            # x(bf16)+k(bf16)+out(f32), x2 buffers
        tmp = 6 * bt * H * W * 4                         # live f32 planes in the unrolled loop
        return const_bytes + io + tmp + (2 << 20) < vmem_budget

    bt = 1
    while (2 * bt * 2 <= B                               # keep grid length >= 2
           and B % (2 * bt) == 0
           and 2 * bt * H * W <= 256 * 256               # only fold for small images
           and fits(2 * bt)):
        bt *= 2
    return bt


def _dc_pallas_call(B, H, W, bt, vmem_limit, single_buffer_consts):
    def const_spec(n):
        if single_buffer_consts:
            # Grid-invariant operand: one pipeline buffer is enough; drops the
            # second VMEM copy of every constant matrix.
            return pl.BlockSpec((n, n), lambda i: (0, 0),
                                pipeline_mode=pl.Buffered(1))
        return pl.BlockSpec((n, n), lambda i: (0, 0))

    blk = pl.BlockSpec((bt, 2, H, W), lambda i: (i, 0, 0, 0))
    mat_h = const_spec(H)
    mat_w = const_spec(W)

    flops = B * (6 * H * H * W + 12 * H * W * W)          # 9 real matmuls, MAC = 2 flops
    bytes_accessed = (B * 2 * H * W * (2 + 2 + 4)         # bf16 x, bf16 k, f32 out
                      + (2 * H * H + 4 * W * W) * 2)      # bf16 constants
    cost = pl.CostEstimate(flops=int(flops), transcendentals=0,
                           bytes_accessed=int(bytes_accessed))

    return pl.pallas_call(
        _dc_kernel,
        out_shape=jax.ShapeDtypeStruct((B, 2, H, W), jnp.float32),
        grid_spec=pltpu.PrefetchScalarGridSpec(
            num_scalar_prefetch=0,
            grid=(B // bt,),
            in_specs=[blk, blk, mat_h, mat_h, mat_w, mat_w, mat_w, mat_w],
            out_specs=blk,
        ),
        compiler_params=pltpu.CompilerParams(
            dimension_semantics=("parallel",),
            vmem_limit_bytes=int(vmem_limit)),
        cost_estimate=cost,
    )


def data_consistency_layer(predicted_img, us_kspace, us_mask, *, batch_tile=None):
    """predicted_img: (B,2,H,W); us_kspace: (B,H,W,2); us_mask: (1,1,W,1)-like."""
    B, C, H, W = predicted_img.shape
    assert C == 2

    # --- mask contract: batch- and H-invariant (fastMRI (1,1,W,1)) ----------
    if int(np.prod(us_mask.shape)) != W:
        raise ValueError(
            "Pallas DataConsistencyLayer requires an undersampling mask that is "
            "batch- and H-invariant (broadcastable to (1,1,W,1)); got shape "
            f"{tuple(us_mask.shape)}")
    mask_w = jnp.reshape(us_mask, (W,)).astype(jnp.float32)

    vmem_limit = _vmem_limit_bytes()
    bt = _pick_batch_tile(B, H, W, vmem_limit) if batch_tile is None else batch_tile
    assert B % bt == 0, (B, bt)

    # --- constant centered DFT operators -------------------------------------
    a_h = _centered_dft_matrix(H)
    a_w = _centered_dft_matrix(W)
    # Identity underpinning the algebraic collapse: centered-ortho inverse ==
    # conj(forward), hence conj(A) @ A == I.
    assert np.allclose(_centered_idft_matrix(H), np.conj(a_h), atol=1e-12)
    b_w = a_w.T                                  # right-multiply operator along W

    ahr = jnp.asarray(np.real(a_h), dtype=jnp.bfloat16)
    ahi = jnp.asarray(np.imag(a_h), dtype=jnp.bfloat16)

    bwr = jnp.asarray(np.real(b_w).astype(np.float32))
    bwi = jnp.asarray(np.imag(b_w).astype(np.float32))

    # M1 = diag(m) @ conj(B_W): pure row scaling, no matmul.
    m_col = mask_w[:, None]
    m1r = (m_col * bwr).astype(jnp.bfloat16)
    m1i = (-(m_col * bwi)).astype(jnp.bfloat16)

    # M2 = B_W @ diag(1-m) @ conj(B_W): one-time (W,W) product in f32 HIGHEST
    # precision (constant-folded by XLA when the mask is static under jit).
    hp = jax.lax.Precision.HIGHEST
    one_m = (1.0 - mask_w)[:, None]
    dr = one_m * bwr
    di = -(one_m * bwi)
    m2r = (jnp.dot(bwr, dr, precision=hp) - jnp.dot(bwi, di, precision=hp)
           ).astype(jnp.bfloat16)
    m2i = (jnp.dot(bwr, di, precision=hp) + jnp.dot(bwi, dr, precision=hp)
           ).astype(jnp.bfloat16)

    # --- inputs in kernel-friendly layouts / dtypes ---------------------------
    # Both the image and the k-space are consumed only as bf16 MXU operands in
    # the kernel, so shipping bf16 halves their DMA with no extra rounding.
    img = predicted_img.astype(jnp.bfloat16)                              # (B,2,H,W)
    ksp = jnp.transpose(us_kspace, (0, 3, 1, 2)).astype(jnp.bfloat16)     # (B,2,H,W)

    args = (img, ksp, ahr, ahi, m1r, m1i, m2r, m2i)
    try:
        out = _dc_pallas_call(B, H, W, bt, vmem_limit, True)(*args)
    except Exception:
        # pipeline_mode=pl.Buffered(1) (single-buffered constants) is not
        # supported by this jax/Mosaic build -> default double buffering.
        out = _dc_pallas_call(B, H, W, bt, vmem_limit, False)(*args)
    return out


# ----------------------------------------------------------------------------
# Pure-JAX reference (fastMRI fft2 / ifft2 semantics) for validation.
# ----------------------------------------------------------------------------
def _reference(predicted_img, us_kspace, us_mask):
    x = predicted_img[:, 0] + 1j * predicted_img[:, 1]          # (B,H,W) complex
    axes = (-2, -1)
    fft2c = lambda a: jnp.fft.fftshift(
        jnp.fft.fft2(jnp.fft.ifftshift(a, axes=axes), norm="ortho", axes=axes), axes=axes)
    ifft2c = lambda a: jnp.fft.fftshift(
        jnp.fft.ifft2(jnp.fft.ifftshift(a, axes=axes), norm="ortho", axes=axes), axes=axes)

    kp = fft2c(x)
    ks = us_kspace[..., 0] + 1j * us_kspace[..., 1]
    m = jnp.broadcast_to(us_mask, us_kspace.shape[:-1] + (1,))[..., 0]
    k = m * ks + (1.0 - m) * kp
    u = ifft2c(k)
    return jnp.stack([u.real, u.imag], axis=1).astype(jnp.float32)


if __name__ == "__main__":
    B, H, W = 2, 16, 16
    key = jax.random.PRNGKey(0)
    k1, k2, k3 = jax.random.split(key, 3)

    predicted_img = jax.random.normal(k1, (B, 2, H, W), dtype=jnp.float32)
    us_kspace = jax.random.normal(k2, (B, H, W, 2), dtype=jnp.float32)
    # binary undersampling mask over kx lines (fastMRI convention: (1,1,W,1))
    us_mask = (jax.random.uniform(k3, (1, 1, W, 1)) < 0.4).astype(jnp.float32)

    out = data_consistency_layer(predicted_img, us_kspace, us_mask)
    out = jax.block_until_ready(out)

    ref = _reference(predicted_img, us_kspace, us_mask)
    assert out.shape == (B, 2, H, W)
    # bf16 MXU math (single-pass, f32 accumulation): tolerance set accordingly.
    assert jnp.allclose(out, ref, atol=5e-2, rtol=5e-2), (
        "max abs err = %f" % float(jnp.max(jnp.abs(out - ref))))

    print("KERNEL_OK")
</pallas_src>

<mosaic_0001>
module attributes {stable_mosaic.version = 11 : i64} {
  func.func @_dc_kernel(%arg0: i32, %arg1: memref<1x2x16x16xbf16, #tpu.memory_space<vmem>>, %arg2: memref<1x2x16x16xbf16, #tpu.memory_space<vmem>>, %arg3: memref<16x16xbf16, #tpu.memory_space<vmem>>, %arg4: memref<16x16xbf16, #tpu.memory_space<vmem>>, %arg5: memref<16x16xbf16, #tpu.memory_space<vmem>>, %arg6: memref<16x16xbf16, #tpu.memory_space<vmem>>, %arg7: memref<16x16xbf16, #tpu.memory_space<vmem>>, %arg8: memref<16x16xbf16, #tpu.memory_space<vmem>>, %arg9: memref<1x2x16x16xf32, #tpu.memory_space<vmem>>) attributes {dimension_semantics = [#tpu.dimension_semantics<parallel>], iteration_bounds = array<i64: 2>, scalar_prefetch = 0 : i64, scratch_operands = 0 : i64, tpu.core_type = #tpu.core_type<tc>, window_params = [{transform_indices = @transform_0, window_bounds = array<i64: 1, 2, 16, 16>}, {transform_indices = @transform_1, window_bounds = array<i64: 1, 2, 16, 16>}, {pipeline_mode = #tpu.pipeline_mode<synchronous>, transform_indices = @transform_2, window_bounds = array<i64: 16, 16>}, {pipeline_mode = #tpu.pipeline_mode<synchronous>, transform_indices = @transform_3, window_bounds = array<i64: 16, 16>}, {pipeline_mode = #tpu.pipeline_mode<synchronous>, transform_indices = @transform_4, window_bounds = array<i64: 16, 16>}, {pipeline_mode = #tpu.pipeline_mode<synchronous>, transform_indices = @transform_5, window_bounds = array<i64: 16, 16>}, {pipeline_mode = #tpu.pipeline_mode<synchronous>, transform_indices = @transform_6, window_bounds = array<i64: 16, 16>}, {pipeline_mode = #tpu.pipeline_mode<synchronous>, transform_indices = @transform_7, window_bounds = array<i64: 16, 16>}, {transform_indices = @transform_8, window_bounds = array<i64: 1, 2, 16, 16>}]} {
    %c0 = arith.constant 0 : index
    %c0_0 = arith.constant 0 : index
    %0 = vector.load %arg3[%c0, %c0_0] : memref<16x16xbf16, #tpu.memory_space<vmem>>, vector<16x16xbf16>
    %c0_1 = arith.constant 0 : index
    %c0_2 = arith.constant 0 : index
    %1 = vector.load %arg4[%c0_1, %c0_2] : memref<16x16xbf16, #tpu.memory_space<vmem>>, vector<16x16xbf16>
    %2 = arith.subf %0, %1 : vector<16x16xbf16>
    %c0_3 = arith.constant 0 : index
    %c0_4 = arith.constant 0 : index
    %3 = vector.load %arg5[%c0_3, %c0_4] : memref<16x16xbf16, #tpu.memory_space<vmem>>, vector<16x16xbf16>
    %c0_5 = arith.constant 0 : index
    %c0_6 = arith.constant 0 : index
    %4 = vector.load %arg6[%c0_5, %c0_6] : memref<16x16xbf16, #tpu.memory_space<vmem>>, vector<16x16xbf16>
    %5 = arith.addf %3, %4 : vector<16x16xbf16>
    %c0_7 = arith.constant 0 : index
    %c0_8 = arith.constant 0 : index
    %6 = vector.load %arg7[%c0_7, %c0_8] : memref<16x16xbf16, #tpu.memory_space<vmem>>, vector<16x16xbf16>
    %c0_9 = arith.constant 0 : index
    %c0_10 = arith.constant 0 : index
    %7 = vector.load %arg8[%c0_9, %c0_10] : memref<16x16xbf16, #tpu.memory_space<vmem>>, vector<16x16xbf16>
    %8 = arith.addf %6, %7 : vector<16x16xbf16>
    %c0_11 = arith.constant 0 : index
    %c0_12 = arith.constant 0 : index
    %c0_13 = arith.constant 0 : index
    %c0_14 = arith.constant 0 : index
    %9 = vector.load %arg2[%c0_11, %c0_12, %c0_13, %c0_14] : memref<1x2x16x16xbf16, #tpu.memory_space<vmem>>, vector<1x1x16x16xbf16>
    %10 = vector.shape_cast %9 : vector<1x1x16x16xbf16> to vector<16x16xbf16>
    %c0_15 = arith.constant 0 : index
    %c1 = arith.constant 1 : index
    %c0_16 = arith.constant 0 : index
    %c0_17 = arith.constant 0 : index
    %11 = vector.load %arg2[%c0_15, %c1, %c0_16, %c0_17] : memref<1x2x16x16xbf16, #tpu.memory_space<vmem>>, vector<1x1x16x16xbf16>
    %12 = vector.shape_cast %11 : vector<1x1x16x16xbf16> to vector<16x16xbf16>
    %cst = arith.constant dense<0.000000e+00> : vector<16x16xf32>
    %13 = tpu.matmul %0, %10, %cst {dimension_numbers = #tpu.dot_dimension_numbers<[1], [0], [0], [1], [0, 0, 1, 1], [], []>} : vector<16x16xbf16>, vector<16x16xbf16>, vector<16x16xf32> -> vector<16x16xf32>
    %cst_18 = arith.constant dense<0.000000e+00> : vector<16x16xf32>
    %14 = tpu.matmul %1, %12, %cst_18 {dimension_numbers = #tpu.dot_dimension_numbers<[1], [0], [0], [1], [0, 0, 1, 1], [], []>} : vector<16x16xbf16>, vector<16x16xbf16>, vector<16x16xf32> -> vector<16x16xf32>
    %15 = arith.addf %10, %12 : vector<16x16xbf16>
    %cst_19 = arith.constant dense<0.000000e+00> : vector<16x16xf32>
    %16 = tpu.matmul %2, %15, %cst_19 {dimension_numbers = #tpu.dot_dimension_numbers<[1], [0], [0], [1], [0, 0, 1, 1], [], []>} : vector<16x16xbf16>, vector<16x16xbf16>, vector<16x16xf32> -> vector<16x16xf32>
    %17 = arith.addf %13, %14 : vector<16x16xf32>
    %18 = arith.truncf %17 : vector<16x16xf32> to vector<16x16xbf16>
    %19 = arith.subf %16, %13 : vector<16x16xf32>
    %20 = arith.addf %19, %14 : vector<16x16xf32>
    %21 = arith.truncf %20 : vector<16x16xf32> to vector<16x16xbf16>
    %cst_20 = arith.constant dense<0.000000e+00> : vector<16x16xf32>
    %22 = tpu.matmul %18, %3, %cst_20 {dimension_numbers = #tpu.dot_dimension_numbers<[1], [0], [0], [1], [0, 0, 1, 1], [], []>} : vector<16x16xbf16>, vector<16x16xbf16>, vector<16x16xf32> -> vector<16x16xf32>
    %cst_21 = arith.constant dense<0.000000e+00> : vector<16x16xf32>
    %23 = tpu.matmul %21, %4, %cst_21 {dimension_numbers = #tpu.dot_dimension_numbers<[1], [0], [0], [1], [0, 0, 1, 1], [], []>} : vector<16x16xbf16>, vector<16x16xbf16>, vector<16x16xf32> -> vector<16x16xf32>
    %24 = arith.addf %18, %21 : vector<16x16xbf16>
    %cst_22 = arith.constant dense<0.000000e+00> : vector<16x16xf32>
    %25 = tpu.matmul %24, %5, %cst_22 {dimension_numbers = #tpu.dot_dimension_numbers<[1], [0], [0], [1], [0, 0, 1, 1], [], []>} : vector<16x16xbf16>, vector<16x16xbf16>, vector<16x16xf32> -> vector<16x16xf32>
    %26 = arith.subf %22, %23 : vector<16x16xf32>
    %27 = arith.subf %25, %22 : vector<16x16xf32>
    %28 = arith.subf %27, %23 : vector<16x16xf32>
    %c0_23 = arith.constant 0 : index
    %c0_24 = arith.constant 0 : index
    %c0_25 = arith.constant 0 : index
    %c0_26 = arith.constant 0 : index
    %29 = vector.load %arg1[%c0_23, %c0_24, %c0_25, %c0_26] : memref<1x2x16x16xbf16, #tpu.memory_space<vmem>>, vector<1x1x16x16xbf16>
    %30 = vector.shape_cast %29 : vector<1x1x16x16xbf16> to vector<16x16xbf16>
    %c0_27 = arith.constant 0 : index
    %c1_28 = arith.constant 1 : index
    %c0_29 = arith.constant 0 : index
    %c0_30 = arith.constant 0 : index
    %31 = vector.load %arg1[%c0_27, %c1_28, %c0_29, %c0_30] : memref<1x2x16x16xbf16, #tpu.memory_space<vmem>>, vector<1x1x16x16xbf16>
    %32 = vector.shape_cast %31 : vector<1x1x16x16xbf16> to vector<16x16xbf16>
    %cst_31 = arith.constant dense<0.000000e+00> : vector<16x16xf32>
    %33 = tpu.matmul %30, %6, %cst_31 {dimension_numbers = #tpu.dot_dimension_numbers<[1], [0], [0], [1], [0, 0, 1, 1], [], []>} : vector<16x16xbf16>, vector<16x16xbf16>, vector<16x16xf32> -> vector<16x16xf32>
    %cst_32 = arith.constant dense<0.000000e+00> : vector<16x16xf32>
    %34 = tpu.matmul %32, %7, %cst_32 {dimension_numbers = #tpu.dot_dimension_numbers<[1], [0], [0], [1], [0, 0, 1, 1], [], []>} : vector<16x16xbf16>, vector<16x16xbf16>, vector<16x16xf32> -> vector<16x16xf32>
    %35 = arith.addf %30, %32 : vector<16x16xbf16>
    %cst_33 = arith.constant dense<0.000000e+00> : vector<16x16xf32>
    %36 = tpu.matmul %35, %8, %cst_33 {dimension_numbers = #tpu.dot_dimension_numbers<[1], [0], [0], [1], [0, 0, 1, 1], [], []>} : vector<16x16xbf16>, vector<16x16xbf16>, vector<16x16xf32> -> vector<16x16xf32>
    %37 = arith.subf %33, %34 : vector<16x16xf32>
    %38 = arith.addf %26, %37 : vector<16x16xf32>
    %c0_34 = arith.constant 0 : index
    %c0_35 = arith.constant 0 : index
    %c0_36 = arith.constant 0 : index
    %c0_37 = arith.constant 0 : index
    %39 = vector.load %arg9[%c0_34, %c0_35, %c0_36, %c0_37] : memref<1x2x16x16xf32, #tpu.memory_space<vmem>>, vector<1x1x16x16xf32>
    %40 = vector.shape_cast %39 : vector<1x1x16x16xf32> to vector<16x16xf32>
    %41 = vector.shape_cast %38 : vector<16x16xf32> to vector<1x1x16x16xf32>
    tpu.vector_store %arg9[%c0_34, %c0_35, %c0_36, %c0_37], %41 {strides = array<i32>} : memref<1x2x16x16xf32, #tpu.memory_space<vmem>>, vector<1x1x16x16xf32>,
    %42 = arith.subf %36, %33 : vector<16x16xf32>
    %43 = arith.subf %42, %34 : vector<16x16xf32>
    %44 = arith.addf %28, %43 : vector<16x16xf32>
    %c0_38 = arith.constant 0 : index
    %c1_39 = arith.constant 1 : index
    %c0_40 = arith.constant 0 : index
    %c0_41 = arith.constant 0 : index
    %45 = vector.load %arg9[%c0_38, %c1_39, %c0_40, %c0_41] : memref<1x2x16x16xf32, #tpu.memory_space<vmem>>, vector<1x1x16x16xf32>
    %46 = vector.shape_cast %45 : vector<1x1x16x16xf32> to vector<16x16xf32>
    %47 = vector.shape_cast %44 : vector<16x16xf32> to vector<1x1x16x16xf32>
    tpu.vector_store %arg9[%c0_38, %c1_39, %c0_40, %c0_41], %47 {strides = array<i32>} : memref<1x2x16x16xf32, #tpu.memory_space<vmem>>, vector<1x1x16x16xf32>,
    return
  }
  func.func @transform_0(%arg0: i32) -> (i32, i32, i32, i32) {
    %c0_i32 = arith.constant 0 : i32
    %c0_i32_0 = arith.constant 0 : i32
    %c0_i32_1 = arith.constant 0 : i32
    %c0_i32_2 = arith.constant 0 : i32
    return %arg0, %c0_i32, %c0_i32_0, %c0_i32_1 : i32, i32, i32, i32
  }
  func.func @transform_1(%arg0: i32) -> (i32, i32, i32, i32) {
    %c0_i32 = arith.constant 0 : i32
    %c0_i32_0 = arith.constant 0 : i32
    %c0_i32_1 = arith.constant 0 : i32
    %c0_i32_2 = arith.constant 0 : i32
    return %arg0, %c0_i32, %c0_i32_0, %c0_i32_1 : i32, i32, i32, i32
  }
  func.func @transform_2(%arg0: i32) -> (i32, i32) {
    %c0_i32 = arith.constant 0 : i32
    %c0_i32_0 = arith.constant 0 : i32
    %c0_i32_1 = arith.constant 0 : i32
    return %c0_i32, %c0_i32_0 : i32, i32
  }
  func.func @transform_3(%arg0: i32) -> (i32, i32) {
    %c0_i32 = arith.constant 0 : i32
    %c0_i32_0 = arith.constant 0 : i32
    %c0_i32_1 = arith.constant 0 : i32
    return %c0_i32, %c0_i32_0 : i32, i32
  }
  func.func @transform_4(%arg0: i32) -> (i32, i32) {
    %c0_i32 = arith.constant 0 : i32
    %c0_i32_0 = arith.constant 0 : i32
    %c0_i32_1 = arith.constant 0 : i32
    return %c0_i32, %c0_i32_0 : i32, i32
  }
  func.func @transform_5(%arg0: i32) -> (i32, i32) {
    %c0_i32 = arith.constant 0 : i32
    %c0_i32_0 = arith.constant 0 : i32
    %c0_i32_1 = arith.constant 0 : i32
    return %c0_i32, %c0_i32_0 : i32, i32
  }
  func.func @transform_6(%arg0: i32) -> (i32, i32) {
    %c0_i32 = arith.constant 0 : i32
    %c0_i32_0 = arith.constant 0 : i32
    %c0_i32_1 = arith.constant 0 : i32
    return %c0_i32, %c0_i32_0 : i32, i32
  }
  func.func @transform_7(%arg0: i32) -> (i32, i32) {
    %c0_i32 = arith.constant 0 : i32
    %c0_i32_0 = arith.constant 0 : i32
    %c0_i32_1 = arith.constant 0 : i32
    return %c0_i32, %c0_i32_0 : i32, i32
  }
  func.func @transform_8(%arg0: i32) -> (i32, i32, i32, i32) {
    %c0_i32 = arith.constant 0 : i32
    %c0_i32_0 = arith.constant 0 : i32
    %c0_i32_1 = arith.constant 0 : i32
    %c0_i32_2 = arith.constant 0 : i32
    return %arg0, %c0_i32, %c0_i32_0, %c0_i32_1 : i32, i32, i32, i32
  }
}

module attributes {stable_mosaic.version = 11 : i64} {
  func.func @_dc_kernel(%arg0: i32, %arg1: memref<1x2x16x16xbf16, #tpu.memory_space<vmem>>, %arg2: memref<1x2x16x16xbf16, #tpu.memory_space<vmem>>, %arg3: memref<16x16xbf16, #tpu.memory_space<vmem>>, %arg4: memref<16x16xbf16, #tpu.memory_space<vmem>>, %arg5: memref<16x16xbf16, #tpu.memory_space<vmem>>, %arg6: memref<16x16xbf16, #tpu.memory_space<vmem>>, %arg7: memref<16x16xbf16, #tpu.memory_space<vmem>>, %arg8: memref<16x16xbf16, #tpu.memory_space<vmem>>, %arg9: memref<1x2x16x16xf32, #tpu.memory_space<vmem>>) attributes {dimension_semantics = [#tpu.dimension_semantics<parallel>], iteration_bounds = array<i64: 2>, scalar_prefetch = 0 : i64, scratch_operands = 0 : i64, tpu.core_type = #tpu.core_type<tc>, window_params = [{transform_indices = @transform_0, window_bounds = array<i64: 1, 2, 16, 16>}, {transform_indices = @transform_1, window_bounds = array<i64: 1, 2, 16, 16>}, {pipeline_mode = #tpu.pipeline_mode<synchronous>, transform_indices = @transform_2, window_bounds = array<i64: 16, 16>}, {pipeline_mode = #tpu.pipeline_mode<synchronous>, transform_indices = @transform_3, window_bounds = array<i64: 16, 16>}, {pipeline_mode = #tpu.pipeline_mode<synchronous>, transform_indices = @transform_4, window_bounds = array<i64: 16, 16>}, {pipeline_mode = #tpu.pipeline_mode<synchronous>, transform_indices = @transform_5, window_bounds = array<i64: 16, 16>}, {pipeline_mode = #tpu.pipeline_mode<synchronous>, transform_indices = @transform_6, window_bounds = array<i64: 16, 16>}, {pipeline_mode = #tpu.pipeline_mode<synchronous>, transform_indices = @transform_7, window_bounds = array<i64: 16, 16>}, {transform_indices = @transform_8, window_bounds = array<i64: 1, 2, 16, 16>}]} {
    %c0 = arith.constant 0 : index
    %c0_0 = arith.constant 0 : index
    %0 = vector.load %arg3[%c0, %c0_0] : memref<16x16xbf16, #tpu.memory_space<vmem>>, vector<16x16xbf16>
    %c0_1 = arith.constant 0 : index
    %c0_2 = arith.constant 0 : index
    %1 = vector.load %arg4[%c0_1, %c0_2] : memref<16x16xbf16, #tpu.memory_space<vmem>>, vector<16x16xbf16>
    %2 = arith.subf %0, %1 : vector<16x16xbf16>
    %c0_3 = arith.constant 0 : index
    %c0_4 = arith.constant 0 : index
    %3 = vector.load %arg5[%c0_3, %c0_4] : memref<16x16xbf16, #tpu.memory_space<vmem>>, vector<16x16xbf16>
    %c0_5 = arith.constant 0 : index
    %c0_6 = arith.constant 0 : index
    %4 = vector.load %arg6[%c0_5, %c0_6] : memref<16x16xbf16, #tpu.memory_space<vmem>>, vector<16x16xbf16>
    %5 = arith.addf %3, %4 : vector<16x16xbf16>
    %c0_7 = arith.constant 0 : index
    %c0_8 = arith.constant 0 : index
    %6 = vector.load %arg7[%c0_7, %c0_8] : memref<16x16xbf16, #tpu.memory_space<vmem>>, vector<16x16xbf16>
    %c0_9 = arith.constant 0 : index
    %c0_10 = arith.constant 0 : index
    %7 = vector.load %arg8[%c0_9, %c0_10] : memref<16x16xbf16, #tpu.memory_space<vmem>>, vector<16x16xbf16>
    %8 = arith.addf %6, %7 : vector<16x16xbf16>
    %c0_11 = arith.constant 0 : index
    %c0_12 = arith.constant 0 : index
    %c0_13 = arith.constant 0 : index
    %c0_14 = arith.constant 0 : index
    %9 = vector.load %arg2[%c0_11, %c0_12, %c0_13, %c0_14] : memref<1x2x16x16xbf16, #tpu.memory_space<vmem>>, vector<1x1x16x16xbf16>
    %10 = vector.shape_cast %9 : vector<1x1x16x16xbf16> to vector<16x16xbf16>
    %c0_15 = arith.constant 0 : index
    %c1 = arith.constant 1 : index
    %c0_16 = arith.constant 0 : index
    %c0_17 = arith.constant 0 : index
    %11 = vector.load %arg2[%c0_15, %c1, %c0_16, %c0_17] : memref<1x2x16x16xbf16, #tpu.memory_space<vmem>>, vector<1x1x16x16xbf16>
    %12 = vector.shape_cast %11 : vector<1x1x16x16xbf16> to vector<16x16xbf16>
    %cst = arith.constant dense<0.000000e+00> : vector<16x16xf32>
    %13 = tpu.matmul %0, %10, %cst {dimension_numbers = #tpu.dot_dimension_numbers<[1], [0], [0], [1], [0, 0, 1, 1], [], []>} : vector<16x16xbf16>, vector<16x16xbf16>, vector<16x16xf32> -> vector<16x16xf32>
    %cst_18 = arith.constant dense<0.000000e+00> : vector<16x16xf32>
    %14 = tpu.matmul %1, %12, %cst_18 {dimension_numbers = #tpu.dot_dimension_numbers<[1], [0], [0], [1], [0, 0, 1, 1], [], []>} : vector<16x16xbf16>, vector<16x16xbf16>, vector<16x16xf32> -> vector<16x16xf32>
    %15 = arith.addf %10, %12 : vector<16x16xbf16>
    %cst_19 = arith.constant dense<0.000000e+00> : vector<16x16xf32>
    %16 = tpu.matmul %2, %15, %cst_19 {dimension_numbers = #tpu.dot_dimension_numbers<[1], [0], [0], [1], [0, 0, 1, 1], [], []>} : vector<16x16xbf16>, vector<16x16xbf16>, vector<16x16xf32> -> vector<16x16xf32>
    %17 = arith.addf %13, %14 : vector<16x16xf32>
    %18 = arith.truncf %17 : vector<16x16xf32> to vector<16x16xbf16>
    %19 = arith.subf %16, %13 : vector<16x16xf32>
    %20 = arith.addf %19, %14 : vector<16x16xf32>
    %21 = arith.truncf %20 : vector<16x16xf32> to vector<16x16xbf16>
    %cst_20 = arith.constant dense<0.000000e+00> : vector<16x16xf32>
    %22 = tpu.matmul %18, %3, %cst_20 {dimension_numbers = #tpu.dot_dimension_numbers<[1], [0], [0], [1], [0, 0, 1, 1], [], []>} : vector<16x16xbf16>, vector<16x16xbf16>, vector<16x16xf32> -> vector<16x16xf32>
    %cst_21 = arith.constant dense<0.000000e+00> : vector<16x16xf32>
    %23 = tpu.matmul %21, %4, %cst_21 {dimension_numbers = #tpu.dot_dimension_numbers<[1], [0], [0], [1], [0, 0, 1, 1], [], []>} : vector<16x16xbf16>, vector<16x16xbf16>, vector<16x16xf32> -> vector<16x16xf32>
    %24 = arith.addf %18, %21 : vector<16x16xbf16>
    %cst_22 = arith.constant dense<0.000000e+00> : vector<16x16xf32>
    %25 = tpu.matmul %24, %5, %cst_22 {dimension_numbers = #tpu.dot_dimension_numbers<[1], [0], [0], [1], [0, 0, 1, 1], [], []>} : vector<16x16xbf16>, vector<16x16xbf16>, vector<16x16xf32> -> vector<16x16xf32>
    %26 = arith.subf %22, %23 : vector<16x16xf32>
    %27 = arith.subf %25, %22 : vector<16x16xf32>
    %28 = arith.subf %27, %23 : vector<16x16xf32>
    %c0_23 = arith.constant 0 : index
    %c0_24 = arith.constant 0 : index
    %c0_25 = arith.constant 0 : index
    %c0_26 = arith.constant 0 : index
    %29 = vector.load %arg1[%c0_23, %c0_24, %c0_25, %c0_26] : memref<1x2x16x16xbf16, #tpu.memory_space<vmem>>, vector<1x1x16x16xbf16>
    %30 = vector.shape_cast %29 : vector<1x1x16x16xbf16> to vector<16x16xbf16>
    %c0_27 = arith.constant 0 : index
    %c1_28 = arith.constant 1 : index
    %c0_29 = arith.constant 0 : index
    %c0_30 = arith.constant 0 : index
    %31 = vector.load %arg1[%c0_27, %c1_28, %c0_29, %c0_30] : memref<1x2x16x16xbf16, #tpu.memory_space<vmem>>, vector<1x1x16x16xbf16>
    %32 = vector.shape_cast %31 : vector<1x1x16x16xbf16> to vector<16x16xbf16>
    %cst_31 = arith.constant dense<0.000000e+00> : vector<16x16xf32>
    %33 = tpu.matmul %30, %6, %cst_31 {dimension_numbers = #tpu.dot_dimension_numbers<[1], [0], [0], [1], [0, 0, 1, 1], [], []>} : vector<16x16xbf16>, vector<16x16xbf16>, vector<16x16xf32> -> vector<16x16xf32>
    %cst_32 = arith.constant dense<0.000000e+00> : vector<16x16xf32>
    %34 = tpu.matmul %32, %7, %cst_32 {dimension_numbers = #tpu.dot_dimension_numbers<[1], [0], [0], [1], [0, 0, 1, 1], [], []>} : vector<16x16xbf16>, vector<16x16xbf16>, vector<16x16xf32> -> vector<16x16xf32>
    %35 = arith.addf %30, %32 : vector<16x16xbf16>
    %cst_33 = arith.constant dense<0.000000e+00> : vector<16x16xf32>
    %36 = tpu.matmul %35, %8, %cst_33 {dimension_numbers = #tpu.dot_dimension_numbers<[1], [0], [0], [1], [0, 0, 1, 1], [], []>} : vector<16x16xbf16>, vector<16x16xbf16>, vector<16x16xf32> -> vector<16x16xf32>
    %37 = arith.subf %33, %34 : vector<16x16xf32>
    %38 = arith.addf %26, %37 : vector<16x16xf32>
    %c0_34 = arith.constant 0 : index
    %c0_35 = arith.constant 0 : index
    %c0_36 = arith.constant 0 : index
    %c0_37 = arith.constant 0 : index
    %39 = vector.load %arg9[%c0_34, %c0_35, %c0_36, %c0_37] : memref<1x2x16x16xf32, #tpu.memory_space<vmem>>, vector<1x1x16x16xf32>
    %40 = vector.shape_cast %39 : vector<1x1x16x16xf32> to vector<16x16xf32>
    %41 = vector.shape_cast %38 : vector<16x16xf32> to vector<1x1x16x16xf32>
    tpu.vector_store %arg9[%c0_34, %c0_35, %c0_36, %c0_37], %41 {strides = array<i32>} : memref<1x2x16x16xf32, #tpu.memory_space<vmem>>, vector<1x1x16x16xf32>,
    %42 = arith.subf %36, %33 : vector<16x16xf32>
    %43 = arith.subf %42, %34 : vector<16x16xf32>
    %44 = arith.addf %28, %43 : vector<16x16xf32>
    %c0_38 = arith.constant 0 : index
    %c1_39 = arith.constant 1 : index
    %c0_40 = arith.constant 0 : index
    %c0_41 = arith.constant 0 : index
    %45 = vector.load %arg9[%c0_38, %c1_39, %c0_40, %c0_41] : memref<1x2x16x16xf32, #tpu.memory_space<vmem>>, vector<1x1x16x16xf32>
    %46 = vector.shape_cast %45 : vector<1x1x16x16xf32> to vector<16x16xf32>
    %47 = vector.shape_cast %44 : vector<16x16xf32> to vector<1x1x16x16xf32>
    tpu.vector_store %arg9[%c0_38, %c1_39, %c0_40, %c0_41], %47 {strides = array<i32>} : memref<1x2x16x16xf32, #tpu.memory_space<vmem>>, vector<1x1x16x16xf32>,
    return
  }
  func.func @transform_0(%arg0: i32) -> (i32, i32, i32, i32) {
    %c0_i32 = arith.constant 0 : i32
    %c0_i32_0 = arith.constant 0 : i32
    %c0_i32_1 = arith.constant 0 : i32
    %c0_i32_2 = arith.constant 0 : i32
    return %arg0, %c0_i32, %c0_i32_0, %c0_i32_1 : i32, i32, i32, i32
  }
  func.func @transform_1(%arg0: i32) -> (i32, i32, i32, i32) {
    %c0_i32 = arith.constant 0 : i32
    %c0_i32_0 = arith.constant 0 : i32
    %c0_i32_1 = arith.constant 0 : i32
    %c0_i32_2 = arith.constant 0 : i32
    return %arg0, %c0_i32, %c0_i32_0, %c0_i32_1 : i32, i32, i32, i32
  }
  func.func @transform_2(%arg0: i32) -> (i32, i32) {
    %c0_i32 = arith.constant 0 : i32
    %c0_i32_0 = arith.constant 0 : i32
    %c0_i32_1 = arith.constant 0 : i32
    return %c0_i32, %c0_i32_0 : i32, i32
  }
  func.func @transform_3(%arg0: i32) -> (i32, i32) {
    %c0_i32 = arith.constant 0 : i32
    %c0_i32_0 = arith.constant 0 : i32
    %c0_i32_1 = arith.constant 0 : i32
    return %c0_i32, %c0_i32_0 : i32, i32
  }
  func.func @transform_4(%arg0: i32) -> (i32, i32) {
    %c0_i32 = arith.constant 0 : i32
    %c0_i32_0 = arith.constant 0 : i32
    %c0_i32_1 = arith.constant 0 : i32
    return %c0_i32, %c0_i32_0 : i32, i32
  }
  func.func @transform_5(%arg0: i32) -> (i32, i32) {
    %c0_i32 = arith.constant 0 : i32
    %c0_i32_0 = arith.constant 0 : i32
    %c0_i32_1 = arith.constant 0 : i32
    return %c0_i32, %c0_i32_0 : i32, i32
  }
  func.func @transform_6(%arg0: i32) -> (i32, i32) {
    %c0_i32 = arith.constant 0 : i32
    %c0_i32_0 = arith.constant 0 : i32
    %c0_i32_1 = arith.constant 0 : i32
    return %c0_i32, %c0_i32_0 : i32, i32
  }
  func.func @transform_7(%arg0: i32) -> (i32, i32) {
    %c0_i32 = arith.constant 0 : i32
    %c0_i32_0 = arith.constant 0 : i32
    %c0_i32_1 = arith.constant 0 : i32
    return %c0_i32, %c0_i32_0 : i32, i32
  }
  func.func @transform_8(%arg0: i32) -> (i32, i32, i32, i32) {
    %c0_i32 = arith.constant 0 : i32
    %c0_i32_0 = arith.constant 0 : i32
    %c0_i32_1 = arith.constant 0 : i32
    %c0_i32_2 = arith.constant 0 : i32
    return %arg0, %c0_i32, %c0_i32_0, %c0_i32_1 : i32, i32, i32, i32
  }
}

</mosaic_0001>

<bundles_post_ra>
// kernel: tpu_custom_call.1
= control target key start
LH: loop header
LB: loop body
LE: loop exit
PB: predicated region body
PF: predicated region fallthrough
CT: control target
= control target key end

     0   :  { %s2065_s0 = inlined_call_operand.hbm [shape: bf16[2,2,16,16], index: 0, kind: input, shape index: {}]   ;;  %s2066_s1 = inlined_call_operand.hbm [shape: bf16[2,2,16,16], index: 1, kind: input, shape index: {}]   ;;  %s2067_s2 = inlined_call_operand.hbm [shape: bf16[16,16], index: 2, kind: input, shape index: {}]   ;;  %s2068_s3 = inlined_call_operand.hbm [shape: bf16[16,16], index: 3, kind: input, shape index: {}]   ;;  %s2069_s4 = inlined_call_operand.hbm [shape: bf16[16,16], index: 4, kind: input, shape index: {}]   ;;  %s2070_s5 = inlined_call_operand.vmem [shape: bf16[16,16], index: 5, kind: input, shape index: {}]   ;;  %s2071_s6 = inlined_call_operand.hbm [shape: bf16[16,16], index: 6, kind: input, shape index: {}]   ;;  %s2072_s7 = inlined_call_operand.hbm [shape: bf16[16,16], index: 7, kind: input, shape index: {}]   ;;  %s2073_s8 = inlined_call_operand.hbm [shape: f32[2,2,16,16], index: 8, kind: output, shape index: {}]  }
   0x1   :  { %2081 = sst [smem:[#allocation22_spill]] %s2065_s0 }
   0x2   :  { %2082 = sst [smem:[#allocation23_spill]] %s2067_s2 }
   0x3   :  { %2083 = sst [smem:[#allocation24_spill]] %s2068_s3 }
   0x4   :  { %2084 = sst [smem:[#allocation25_spill]] %s2069_s4 }
   0x5   :  { %2085 = sst [smem:[#allocation26_spill]] %s2071_s6 }
   0x6   :  { %2086 = sst [smem:[#allocation27_spill]] %s2072_s7 }
   0x7   :  { %13 = vsyncpa [#allocation3], 0 }
   0x8   :  { %15 = vsyncpa [#allocation3 + $0x1], 0 }
   0x9   :  { %16 = vsyncpa [#allocation6], 0 }
   0xa   :  { %18 = vsyncpa [#allocation6 + $0x1], 0 }
   0xb   :  { %19 = vsyncpa [#allocation9], 0 }
   0xc   :  { %20 = vsyncpa [#allocation12], 0 }
   0xd   :  { %21 = vsyncpa [#allocation4], 0 }
   0xe   :  { %23 = vsyncpa [#allocation4 + $0x1], 0  ;;  %s1715_s27 = smov 0   ;;  %s1717_s28 = smov 0  }
   0xf   :  { %s1719_s29 = smov 0   ;;  %s1721_s30 = smov 0  }
  0x10 LB: > { %s1656_s9 = smov [#allocation7]   ;;  %s1736_s11 = sadd.s32 4294967295, %s1654_s30   ;;  %s1654_s30 = sphi %s1721_s30, %s2117_s30   ;;  %s1650_s29 = sphi %s1719_s29, %s2116_s29   ;;  %s1646_s28 = sphi %s1717_s28, %s2115_s28   ;;  %s1642_s27 = sphi %s1715_s27, %s2114_s27  }
  0x11   : > { %s250_s10 = sshll.u32 %s1656_s9, 4  ;;  %p1138_p0 = scmp.ge.s32.totalorder %s1654_s30, 1  ;;  %s251_s10 = int_to_ptr.vmem [resolvable:$true] %s250_s10 }
  0x12   : > { %p2078_p1 = scmp.eq.s32.totalorder %s1736_s11, 0  ;;  %p238_p2 = scmp.lt.s32.totalorder %s1654_s30, 3 }
  0x13   : > { %s1657_s13 = smov [#allocation8]   ;;  %s1658_s16 = smov [#allocation11]  }
  0x14   : > { %p1741_p3 = pnand %p1138_p0, %p238_p2  ;;  %s263_s14 = sshll.u32 %s1657_s13, 4  ;;  %s1754_s14 = int_to_ptr.vmem [resolvable:$true] %s263_s14 }
  0x15   : > { %s292_s17 = sshll.u32 %s1658_s16, 4  ;;  %s1399_s19 = scalar_lea.vmem %s251_s10, 128  ;;  %s1756_s17 = int_to_ptr.vmem [resolvable:$true] %s292_s17 }
  0x16   : > { %p1296_p5 = pneg %p1741_p3  ;;  %p1400_p8 = scmp.ne.s32.totalorder %s251_s10, %s1399_s19 }
  0x17   : > { %p1407_p11 = scmp.lt.s32.totalorder %s251_s10, %s251_s10  ;;  %p1408_p12 = scmp.lt.s32.totalorder %s1399_s19, %s1399_s19 }
  0x18   : > { %p1750_p6 = pnand %p1296_p5, %p2078_p1 }
  0x19   : > { %p1409_p13 = por %p1408_p12, %p1407_p11 }
  0x1a   : > { %p1760_p7 = pneg %p1750_p6 }
  0x1c   : > { %p1402_p9 = pnand %p1400_p8, %p1760_p7 }
  0x1e   : > { %p1403_p10 = pneg %p1402_p9 }
  0x20   : > { %p1410_p0 = pnand %p1409_p13, %p1403_p10 }
  0x22   : > { %1413 = shalt.err (!%p1410_p0)
}
  0x23   : > { %s2074_s20 = smov 64   ;;  %s2076_s21 = smov 4  }
  0x24   : > { %s2090_s2 = sld [smem:[#allocation23_spill]]  ;;  %s1425_s24 = scalar_lea.vmem %s1754_s14, 128 }
  0x25   : > { %p1426_p2 = scmp.ne.s32.totalorder %s1754_s14, %s1425_s24  ;;  %p1433_p9 = scmp.lt.s32.totalorder %s1754_s14, %s1754_s14 }
  0x26   : > { %p1434_p10 = scmp.lt.s32.totalorder %s1425_s24, %s1425_s24 }
  0x27   : > { %p1428_p5 = pnand %p1426_p2, %p1760_p7 }
  0x28   : > { %p1435_p11 = por %p1434_p10, %p1433_p9 }
  0x29   : > { %p1429_p8 = pneg %p1428_p5 }
  0x2a   : > { %1299 = dma.hbm_to_vmem [thread:$0]  (!%p1750_p6), %s2090_s2, 128, %s251_s10, [#allocation6], %s2074_s20, %s2074_s20, %s2076_s21  }
  0x2b   : > { %p1436_p12 = pnand %p1435_p11, %p1429_p8 }
  0x2d   : > { %1439 = shalt.err (!%p1436_p12)
}
  0x2e   : > { %s2091_s3 = sld [smem:[#allocation24_spill]]  ;;  %s1451_s9 = scalar_lea.vmem %s1756_s17, 128 }
  0x2f   : > { %p1452_p13 = scmp.ne.s32.totalorder %s1756_s17, %s1451_s9  ;;  %p1459_p5 = scmp.lt.s32.totalorder %s1756_s17, %s1756_s17 }
  0x30   : > { %p1460_p8 = scmp.lt.s32.totalorder %s1451_s9, %s1451_s9 }
  0x31   : > { %p1454_p0 = pnand %p1452_p13, %p1760_p7 }
  0x32   : > { %p1461_p9 = por %p1460_p8, %p1459_p5 }
  0x33   : > { %p1455_p2 = pneg %p1454_p0 }
  0x34   : > { %1302 = dma.hbm_to_vmem [thread:$0]  (!%p1750_p6), %s2091_s3, 128, %s1754_s14, [#allocation9], %s2074_s20, %s2074_s20, %s2076_s21  }
  0x35   : > { %p1462_p10 = pnand %p1461_p9, %p1455_p2 }
  0x37   : > { %1465 = shalt.err (!%p1462_p10)
}
  0x38   : > { %s2092_s6 = sld [smem:[#allocation26_spill]]  ;;  %s1661_s14 = smov [#allocation10]  }
  0x39   : > { %s276_s16 = sshll.u32 %s1661_s14, 4  ;;  %s1662_s19 = smov [#allocation13]   ;;  %s277_s16 = int_to_ptr.vmem [resolvable:$true] %s276_s16 }
  0x3a   : > { %s305_s22 = sshll.u32 %s1662_s19, 4  ;;  %s1477_s23 = scalar_lea.vmem %s277_s16, 128  ;;  %s306_s22 = int_to_ptr.vmem [resolvable:$true] %s305_s22 }
  0x3b   : > { %p1478_p11 = scmp.ne.s32.totalorder %s277_s16, %s1477_s23  ;;  %p1485_p0 = scmp.lt.s32.totalorder %s277_s16, %s277_s16 }
  0x3c   : > { %p1486_p2 = scmp.lt.s32.totalorder %s1477_s23, %s1477_s23 }
  0x3d   : > { %p1480_p12 = pnand %p1478_p11, %p1760_p7 }
  0x3e   : > { %1308 = dma.hbm_to_vmem [thread:$0]  (!%p1750_p6), %s2092_s6, 128, %s1756_s17, [#allocation12], %s2074_s20, %s2074_s20, %s2076_s21  }
  0x3f   : > { %p1481_p13 = pneg %p1480_p12  ;;  %p1487_p5 = por %p1486_p2, %p1485_p0 }
  0x41   : > { %p1488_p8 = pnand %p1487_p5, %p1481_p13 }
  0x43   : > { %1491 = shalt.err (!%p1488_p8)
}
  0x44   : > { %s2093_s4 = sld [smem:[#allocation25_spill]]  ;;  %s1503_s25 = scalar_lea.vmem %s306_s22, 128 }
  0x45   : > { %p1504_p9 = scmp.ne.s32.totalorder %s306_s22, %s1503_s25  ;;  %p1511_p12 = scmp.lt.s32.totalorder %s306_s22, %s306_s22 }
  0x46   : > { %p1512_p0 = scmp.lt.s32.totalorder %s1503_s25, %s1503_s25 }
  0x47   : > { %p1506_p10 = pnand %p1504_p9, %p1760_p7 }
  0x48   : > { %p1513_p13 = por %p1512_p0, %p1511_p12 }
  0x49   : > { %p1507_p11 = pneg %p1506_p10 }
  0x4a   : > { %1305 = dma.hbm_to_vmem [thread:$0]  (!%p1750_p6), %s2093_s4, 128, %s277_s16, [#allocation9], %s2074_s20, %s2074_s20, %s2076_s21  }
  0x4b   : > { %p1514_p2 = pnand %p1513_p13, %p1507_p11 }
  0x4d   : > { %1517 = shalt.err (!%p1514_p2)
}
  0x4e   : > { %s2094_s7 = sld [smem:[#allocation27_spill]]  ;;  %s1137_s15 = sadd.s32 4294967294, %s1654_s30  }
  0x4f   : > { %s1826_s18 = sadd.s32 1, %s1654_s30   ;;  %s36_s10 = sadd.s32 1, %s1650_s29 }
  0x50   : > { %s33_s13 = ssub.s32 %s1654_s30, %s1826_s18  ;;  %p43_p7 = scmp.ne.s32.totalorder %s1650_s29, %s1646_s28 }
  0x51   : > { %p34_p5 = scmp.eq.s32.totalorder %s33_s13, 0  ;;  %p44_p8 = scmp.eq.s32.totalorder %s1654_s30, 0 }
  0x52   : > { %p49_p9 = scmp.ne.s32.totalorder %s1646_s28, %s1642_s27  ;;  %p225_p10 = scmp.eq.s32.totalorder %s1736_s11, 1 }
  0x53   : > { %s1838_s14 = scalar_select %p34_p5, %s1650_s29, %s36_s10  }
  0x54   : > { %1311 = dma.hbm_to_vmem [thread:$0]  (!%p1750_p6), %s2094_s7, 128, %s306_s22, [#allocation12], %s2074_s20, %s2074_s20, %s2076_s21  }
  0x55   : > { %2095 = sst [smem:[#allocation21_spill]] %s1838_s14  ;;  %p45_p11 = por %p44_p8, %p43_p7 }
  0x56   : > { %p1842_p12 = por %p2078_p1, %p49_p9  ;;  %p1846_p6 = por %p225_p10, %p43_p7 }
  0x57   : > { %p231_p0 = scmp.eq.s32.totalorder %s1137_s15, 1  ;;  %p1328_p13 = scmp.lt.s32.totalorder %s1654_s30, 2 }
  0x58   : > { %s2096_s16 = scalar_select %p1842_p12, 1, 0 }
  0x59   : > { %s2097_s19 = scalar_select %p1846_p6, 1, 0 }
  0x5a   : > { %s319_s22 = sand.u32 1, %s1650_s29   ;;  %p1852_p2 = por %p231_p0, %p49_p9 }
  0x5b   : > { %s1856_s17 = sshll.u32 %s319_s22, 4  ;;  %s1195_s24 = sshll.u32 %s1654_s30, 8 }
  0x5c   : > { %s2098_s23 = scalar_select %p1852_p2, 1, 0 }
  0x5d   : > { %s2099_s0 = sld [smem:[#allocation22_spill]]  ;;  %s323_s10 = scalar_lea.vmem [#allocation2], %s1856_s17 }
  0x5e   : > { %s330_s15 = sshll.u32 %s323_s10, 4  ;;  %p1865_p7 = pnand %p1328_p13, %p45_p11  ;;  %s1869_s15 = int_to_ptr.vmem [resolvable:$true] %s330_s15 }
  0x5f   : > { %s1874_s2 = scalar_lea.hbm %s2066_s1, %s1195_s24  ;;  %s1876_s25 = scalar_lea.sflag [#allocation3], %s319_s22 }
  0x60   : > { %p1520_p8 = pneg %p1865_p7 }
  0x63   : > { %s1862_s9 = scalar_lea.hbm %s2099_s0, %s1195_s24  ;;  %s1523_s4 = scalar_lea.hbm %s2099_s0, 512 }
  0x64   : > { %s1518_s26 = scalar_lea.hbm %s1862_s9, 256  ;;  %p1524_p11 = scmp.lt.s32.totalorder %s1862_s9, %s2099_s0 }
  0x65   : > { %p1519_p5 = scmp.ne.s32.totalorder %s1862_s9, %s1518_s26  ;;  %p1525_p0 = scmp.lt.s32.totalorder %s1523_s4, %s1518_s26 }
  0x67   : > { %p1521_p9 = pnand %p1520_p8, %p1519_p5  ;;  %p1526_p13 = por %p1525_p0, %p1524_p11 }
  0x69   : > { %p1522_p10 = pneg %p1521_p9 }
  0x6b   : > { %p1527_p4 = pnand %p1526_p13, %p1522_p10 }
  0x6d   : > { %1530 = shalt.err (!%p1527_p4)
}
  0x6e   : > { %s1531_s20 = scalar_lea.vmem %s1869_s15, 256  ;;  %s1663_s3 = smov [#allocation2]  }
  0x6f   : > { %p1532_p1 = scmp.ne.s32.totalorder %s1869_s15, %s1531_s20  ;;  %s1536_s21 = sshll.u32 %s1663_s3, 4  ;;  %s1537_s21 = int_to_ptr.vmem [resolvable:$false] %s1536_s21 }
  0x70   : > { %s1538_s22 = scalar_lea.vmem %s1537_s21, 512  ;;  %p1539_p2 = scmp.lt.s32.totalorder %s1869_s15, %s1537_s21 }
  0x71   : > { %p1534_p5 = pnand %p1532_p1, %p1520_p8  ;;  %p1540_p6 = scmp.lt.s32.totalorder %s1538_s22, %s1531_s20 }
  0x73   : > { %p1535_p9 = pneg %p1534_p5  ;;  %p1541_p12 = por %p1540_p6, %p1539_p2 }
  0x75   : > { %p1542_p11 = pnand %p1541_p12, %p1535_p9 }
  0x77   : > { %1545 = shalt.err (!%p1542_p11)
}
  0x78   : > { %s2101_s4 = smov 4   ;;  %s2102_s6 = smov 64  }
  0x79   : > { %1315 = dma.hbm_to_vmem [thread:$0]  (!%p1865_p7), %s1862_s9, 256, %s1869_s15, %s1876_s25, %s2102_s6, %s2102_s6, %s2101_s4  }
  0x7a   : > { %s344_s7 = scalar_lea.vmem [#allocation5], %s1856_s17  ;;  %s340_s26 = sand.u32 1, %s1654_s30  }
  0x7b   : > { %s351_s24 = sshll.u32 %s344_s7, 4  ;;  %s341_s10 = scalar_lea.sflag [#allocation6], %s340_s26  ;;  %s1908_s24 = int_to_ptr.vmem [resolvable:$true] %s351_s24 }
  0x7c   : > { %s1546_s20 = scalar_lea.hbm %s1874_s2, 256  ;;  %s1551_s22 = scalar_lea.hbm %s2066_s1, 512 }
  0x7d   : > { %p1547_p1 = scmp.ne.s32.totalorder %s1874_s2, %s1546_s20  ;;  %p1552_p6 = scmp.lt.s32.totalorder %s1874_s2, %s2066_s1 }
  0x7e   : > { %p1553_p2 = scmp.lt.s32.totalorder %s1551_s22, %s1546_s20 }
  0x7f   : > { %p1549_p4 = pnand %p1547_p1, %p1520_p8 }
  0x80   : > { %p1554_p10 = por %p1553_p2, %p1552_p6 }
  0x81   : > { %p1550_p12 = pneg %p1549_p4 }
  0x83   : > { %p1555_p0 = pnand %p1554_p10, %p1550_p12 }
  0x85   : > { %1558 = shalt.err (!%p1555_p0)
}
  0x86   : > { %s1559_s17 = scalar_lea.vmem %s1908_s24, 256  ;;  %s1664_s9 = smov [#allocation5]  }
  0x87   : > { %p1560_p13 = scmp.ne.s32.totalorder %s1908_s24, %s1559_s17  ;;  %s1564_s15 = sshll.u32 %s1664_s9, 4  ;;  %s1565_s15 = int_to_ptr.vmem [resolvable:$false] %s1564_s15 }
  0x88   : > { %s1566_s25 = scalar_lea.vmem %s1565_s15, 512  ;;  %p1567_p11 = scmp.lt.s32.totalorder %s1908_s24, %s1565_s15 }
  0x89   : > { %p1562_p5 = pnand %p1560_p13, %p1520_p8  ;;  %p1568_p1 = scmp.lt.s32.totalorder %s1566_s25, %s1559_s17 }
  0x8b   : > { %p1563_p9 = pneg %p1562_p5  ;;  %p1569_p4 = por %p1568_p1, %p1567_p11 }
  0x8d   : > { %p1570_p6 = pnand %p1569_p4, %p1563_p9 }
  0x8f   : > { %1573 = shalt.err (!%p1570_p6)
}
  0x90   : > { %1318 = dma.hbm_to_vmem [thread:$0]  (!%p1865_p7), %s1874_s2, 256, %s1908_s24, %s341_s10, %s2102_s6, %s2102_s6, %s2101_s4  }
  0x91   : > { %363 = sbr.rel (%p1741_p3) target bundleno = 615 (0x267), region = 52  ;;  %s1938_s0 = sand.u32 (!%p1741_p3), 1, %s1646_s28  }
  0x92   : > { %s1152_s14 = sshll.u32 (!%p1741_p3), %s1938_s0, 4  ;;  %s366_s7 = scalar_lea.sflag (!%p1741_p3), [#allocation3], %s1938_s0 }
  0x93   : > { %s1942_s26 = scalar_lea.vmem (!%p1741_p3), [#allocation2], %s1152_s14  ;;  %p2103_p8 = scmp.ne.s32.totalorder (!%p1741_p3), %s2096_s16, 0 }
  0x96   : > { %1617 = dma.done.wait (%p2103_p8), %s366_s7, 256  }
  0x97   : > { %1619 = vsyncadd (%p2103_p8), %s366_s7, 4294967040  ;;  %s374_s2 = sand.u32 1, %s1736_s11   ;;  %s378_s13 = scalar_lea.vmem [#allocation5], %s1152_s14 }
  0x98   : > { %s375_s12 = scalar_lea.sflag [#allocation6], %s374_s2 }
  0x99   : > { %1621 = dma.done.wait (%p2103_p8), %s375_s12, 256  }
  0x9a   : > { %1623 = vsyncadd (%p2103_p8), %s375_s12, 4294967040  ;;  %p2104_p3 = scmp.eq.s32.totalorder %s1736_s11, 0 }
  0x9c   : > { %1625 = dma.done.wait (%p2104_p3), [#allocation6], 128   ;;  %p2105_p7 = pmov %p2104_p3 }
  0x9d   : > { %p2106_p12 = pmov %p2104_p3 }
  0x9e   : > { %1627 = vsyncadd (%p2105_p7), [#allocation6], 4294967168 }
  0x9f   : > { %1629 = dma.done.wait (%p2106_p12), [#allocation9], 256   ;;  %p2107_p2 = pmov %p2104_p3 }
  0xa1   : > { %1631 = vsyncadd (%p2107_p2), [#allocation9], 4294967040  ;;  %p2108_p10 = pmov %p2107_p2 }
  0xa2   : > { %p2109_p0 = pmov %p2107_p2 }
  0xa3   : > { %1633 = dma.done.wait (%p2108_p10), [#allocation12], 256  }
  0xa4   : > { %1635 = vsyncadd (%p2109_p0), [#allocation12], 4294967040  ;;  %v1665_v0 = vmov 0.0   ;;  %vm1666_vm0 = vmmov 0   ;;  %v455_v1 = vld [vmem:[%s378_s13] sm:$0xf] }
  0xa5   : > { %1216 = vmatprep.subr.bf16.mxu0 %v1665_v0  ;;  %1222 = vmatprep.subr.bf16.mxu1 %v1665_v0  ;;  %v456_v2 = vld [vmem:[%s378_s13 + $0x4] sm:$0xf]  ;;  %v1160_v3 = vld [vmem:[%s378_s13 + $0x8] sm:$0xf]  ;;  %v1161_v5 = vld [vmem:[%s378_s13 + $0xc] sm:$0xf] }
  0xa6   : > { %1218 = vmatprep.mubr.msk.bf16.mxu0 %vm1666_vm0, %v1665_v0  ;;  %1224 = vmatprep.mubr.msk.bf16.mxu1 %vm1666_vm0, %v1665_v0  ;;  %v1163_v4 = vcombine.low %v455_v1, %v456_v2  ;;  %v571_v6 = vadd.bf16 %v1160_v3, %v455_v1  ;;  %v437_v7 = vld [vmem:[#allocation7] sm:$0xf]  ;;  %v438_v8 = vld [vmem:[#allocation7 + $0x4] sm:$0xf]  ;;  %v1166_v9 = vcombine.low %v1160_v3, %v1161_v5  ;;  %v439_v12 = vld [vmem:[#allocation8] sm:$0xf] }
  0xa7   : > { %v572_v10 = vadd.bf16 %v1161_v5, %v456_v2  ;;  %v1162_v11 = vcombine.low %v437_v7, %v438_v8  ;;  %v440_v13 = vld [vmem:[#allocation8 + $0x4] sm:$0xf]  ;;  %vm471_vm1 = vcmask 130048   ;;  %v441_v16 = vsub.bf16 %v437_v7, %v439_v12  ;;  %v443_v19 = vld [vmem:[#allocation10] sm:$0xf]  ;;  %s1159_s10 = sshll.u32 %s1938_s0, 5 }
  0xa8   : > { %1217 = vmatpush3.bf16.msra.mxu0 %v1163_v4  ;;  %v1165_v14 = vcombine.low %v439_v12, %v440_v13  ;;  %1223 = vmatpush3.bf16.msra.mxu1 %v1166_v9  ;;  %v442_v17 = vsub.bf16 %v438_v8, %v440_v13  ;;  %v444_v20 = vld [vmem:[#allocation10 + $0x4] sm:$0xf]  ;;  %v445_v22 = vld [vmem:[%s2070_s5] sm:$0xf]  ;;  %v446_v23 = vld [vmem:[%s2070_s5 + $0x4] sm:$0xf] }
  0xa9   : > { %v1169_v15 = vcombine.low %v571_v6, %v572_v10  ;;  %1228 = vmatprep.subr.bf16.mxu0 %v1665_v0  ;;  %1234 = vmatprep.subr.bf16.mxu1 %v1665_v0  ;;  %v1171_v21 = vcombine.low %v443_v19, %v444_v20  ;;  %v1173_v24 = vcombine.low %v445_v22, %v446_v23  ;;  %v449_v44 = vld [vmem:[#allocation11] sm:$0xf]  ;;  %v450_v45 = vld [vmem:[#allocation11 + $0x4] sm:$0xf]  ;;  %v451_v49 = vld [vmem:[#allocation13] sm:$0xf] }
  0xaa   : > { %v1168_v18 = vcombine.low %v441_v16, %v442_v17  ;;  %v447_v25 = vadd.bf16 %v445_v22, %v443_v19  ;;  %v448_v26 = vadd.bf16 %v446_v23, %v444_v20  ;;  %v452_v50 = vld [vmem:[#allocation13 + $0x4] sm:$0xf]  ;;  %v1180_v51 = vcombine.low %v449_v44, %v450_v45  ;;  %v793_v55 = vld [vmem:[%s1942_s26] sm:$0xf]  ;;  %v1177_v59 = vld [vmem:[%s1942_s26 + $0x8] sm:$0xf] }
  0xab   : > { %1219 = vmatmul.mubr.msk.bf16.vlgmr.msra.gmra.mxu0 %vm471_vm1, %v1162_v11  ;;  %1225 = vmatmul.mubr.msk.bf16.vlgmr.msra.gmra.mxu1 %vm471_vm1, %v1165_v14  ;;  %v1183_v53 = vcombine.low %v451_v49, %v452_v50  ;;  %v794_v56 = vld [vmem:[%s1942_s26 + $0x4] sm:$0xf]  ;;  %v453_v57 = vadd.bf16 %v451_v49, %v449_v44  ;;  %v454_v58 = vadd.bf16 %v452_v50, %v450_v45  ;;  %v1178_v60 = vld [vmem:[%s1942_s26 + $0xc] sm:$0xf]  ;;  %s435_s20 = scalar_lea.vmem [#allocation14], %s1159_s10  ;;  %s1197_s21 = sshll.u32 %s1736_s11, 9 }
  0xac   : > { %1229 = vmatpush3.bf16.msra.mxu0 %v1169_v15  ;;  %1230 = vmatprep.mubr.msk.bf16.mxu0 %vm1666_vm0, %v1665_v0  ;;  %v1175_v27 = vcombine.low %v447_v25, %v448_v26  ;;  %v1179_v61 = vcombine.low %v793_v55, %v794_v56  ;;  %v1182_v63 = vcombine.low %v1177_v59, %v1178_v60  ;;  %s994_s3 = sshll.u32 %s435_s20, 4  ;;  %s2019_s9 = scalar_lea.hbm %s2073_s8, %s1197_s21  ;;  %s2021_s3 = int_to_ptr.vmem [resolvable:$true] %s994_s3 }
  0xad   : > { %1236 = vmatprep.mubr.msk.bf16.mxu1 %vm1666_vm0, %v1665_v0  ;;  %1240 = vmatprep.subr.bf16.mxu0 %v1665_v0  ;;  %v1186_v62 = vcombine.low %v453_v57, %v454_v58  ;;  %v908_v1 = vadd.bf16 %v1177_v59, %v793_v55  ;;  %v909_v2 = vadd.bf16 %v1178_v60, %v794_v56  ;;  %s981_s15 = scalar_lea.sflag [#allocation4], %s1938_s0  ;;  %s1574_s11 = scalar_lea.vmem %s2021_s3, 512 }
  0xae   : > { %1235 = vmatpush3.bf16.msra.mxu1 %v1171_v21  ;;  %p1575_p13 = scmp.ne.s32.totalorder %s2021_s3, %s1574_s11  ;;  %p2110_p5 = scmp.ne.s32.totalorder %s2097_s19, 0 }
  0xaf   : > { %1246 = vmatprep.subr.bf16.mxu1 %v1665_v0  ;;  %v1185_v3 = vcombine.low %v908_v1, %v909_v2  ;;  %s1667_s25 = smov [#allocation14]  }
  0xb0   : > { %p1576_p9 = pnand %p1575_p13, %p2110_p5  ;;  %s1578_s14 = sshll.u32 %s1667_s25, 4  ;;  %s1579_s14 = int_to_ptr.vmem [resolvable:$false] %s1578_s14 }
  0xb1   : > { %s1580_s7 = scalar_lea.vmem %s1579_s14, 1024  ;;  %p1581_p1 = scmp.lt.s32.totalorder %s2021_s3, %s1579_s14 }
  0xb2   : > { %p1577_p11 = pneg %p1576_p9  ;;  %p1582_p4 = scmp.lt.s32.totalorder %s1580_s7, %s1574_s11 }
  0xb3   : > { %1231 = vmatmul.mubr.msk.bf16.vlgmr.msra.gmra.mxu0 %vm471_vm1, %v1168_v18 }
  0xb4   : > { %1242 = vmatprep.mubr.msk.bf16.mxu0 %vm1666_vm0, %v1665_v0  ;;  %1241 = vmatpush3.bf16.msra.mxu0 %v1173_v24  ;;  %p1583_p6 = por %p1582_p4, %p1581_p1 }
  0xb5   : > { %1252 = vmatprep.subr.bf16.mxu0 %v1665_v0 }
  0xb6   : > { %p1584_p8 = pnand %p1583_p6, %p1577_p11 }
 0x16b   : > { %v509_v28 = vpop.f32.mrf.mxu0  ;;  %v564_v29 = vpop.f32.mrf.mxu1 }
 0x16c   : > { %v628_v34 = vadd.f32 %v564_v29, %v509_v28 }
 0x16d   : > { %v1220_v30 = vpop.f32.mrf.mxu0  ;;  %v1226_v31 = vpop.f32.mrf.mxu1 }
 0x16f   : > { %v512_v32 = vpop.f32.mrf.mxu0  ;;  %v567_v33 = vpop.f32.mrf.mxu1 }
 0x170   : > { %v629_v35 = vadd.f32 %v567_v33, %v512_v32 }
 0x171   : > { %v1221_v36 = vpop.f32.mrf.mxu0  ;;  %v1227_v37 = vpop.f32.mrf.mxu1 }
 0x172   : > { %v630_v38 = vpack.c.bf16 %v629_v35, %v628_v34 }
 0x173   : > { %v621_v39 = vpop.f32.mrf.mxu0 }
 0x174   : > { %1237 = vmatmul.mubr.msk.bf16.vlgmr.msra.gmra.mxu1 %vm471_vm1, %v630_v38  ;;  %v631_v41 = vsub.f32 %v621_v39, %v509_v28 }
 0x175   : > { %v1232_v40 = vpop.f32.mrf.mxu0  ;;  %1247 = vmatpush3.bf16.msra.mxu1 %v1175_v27  ;;  %1248 = vmatprep.mubr.msk.bf16.mxu1 %vm1666_vm0, %v1665_v0 }
 0x176   : > { %1258 = vmatprep.subr.bf16.mxu1 %v1665_v0  ;;  %v633_v47 = vadd.f32 %v631_v41, %v564_v29 }
 0x177   : > { %v624_v42 = vpop.f32.mrf.mxu0 }
 0x178   : > { %v632_v43 = vsub.f32 %v624_v42, %v512_v32 }
 0x179   : > { %v1233_v46 = vpop.f32.mrf.mxu0 }
 0x17a   : > { %v634_v48 = vadd.f32 %v632_v43, %v567_v33 }
 0x17c   : > { %v635_v52 = vpack.c.bf16 %v634_v48, %v633_v47 }
 0x17e   : > { %v736_v54 = vadd.bf16 %v635_v52, %v630_v38  ;;  %1243 = vmatmul.mubr.msk.bf16.vlgmr.msra.gmra.mxu0 %vm471_vm1, %v635_v52 }
 0x17f   : > { %1253 = vmatpush3.bf16.msra.mxu0 %v1180_v51  ;;  %1254 = vmatprep.mubr.msk.bf16.mxu0 %vm1666_vm0, %v1665_v0 }
 0x180   : > { %1249 = vmatmul.mubr.msk.bf16.vlgmr.msra.gmra.mxu1 %vm471_vm1, %v736_v54  ;;  %1264 = vmatprep.subr.bf16.mxu0 %v1665_v0 }
 0x181   : > { %1259 = vmatpush3.bf16.msra.mxu1 %v1183_v53  ;;  %1260 = vmatprep.mubr.msk.bf16.mxu1 %vm1666_vm0, %v1665_v0 }
 0x186   : > { %1255 = vmatmul.mubr.msk.bf16.vlgmr.msra.gmra.mxu0 %vm471_vm1, %v1179_v61 }
 0x187   : > { %1265 = vmatpush3.bf16.msra.mxu0 %v1186_v62  ;;  %1266 = vmatprep.mubr.msk.bf16.mxu0 %vm1666_vm0, %v1665_v0 }
 0x188   : > { %1261 = vmatmul.mubr.msk.bf16.vlgmr.msra.gmra.mxu1 %vm471_vm1, %v1182_v63 }
 0x18e   : > { %1267 = vmatmul.mubr.msk.bf16.vlgmr.msra.gmra.mxu0 %vm471_vm1, %v1185_v3 }
 0x234   : > { %v679_v4 = vpop.f32.mrf.mxu1 }
 0x236   : > { %v1238_v5 = vpop.f32.mrf.mxu1 }
 0x238   : > { %v682_v6 = vpop.f32.mrf.mxu1 }
 0x23a   : > { %v1239_v7 = vpop.f32.mrf.mxu1 }
 0x23e   : > { %v729_v8 = vpop.f32.mrf.mxu0 }
 0x23f   : > { %v787_v18 = vsub.f32 %v679_v4, %v729_v8 }
 0x240   : > { %v1244_v9 = vpop.f32.mrf.mxu0  ;;  %v780_v10 = vpop.f32.mrf.mxu1 }
 0x241   : > { %v789_v25 = vsub.f32 %v780_v10, %v679_v4 }
 0x242   : > { %v732_v11 = vpop.f32.mrf.mxu0  ;;  %v1250_v12 = vpop.f32.mrf.mxu1 }
 0x243   : > { %v788_v26 = vsub.f32 %v682_v6, %v732_v11  ;;  %v791_v33 = vsub.f32 %v789_v25, %v729_v8 }
 0x244   : > { %v1245_v13 = vpop.f32.mrf.mxu0  ;;  %v783_v14 = vpop.f32.mrf.mxu1 }
 0x245   : > { %v790_v34 = vsub.f32 %v783_v14, %v682_v6 }
 0x246   : > { %v1251_v15 = vpop.f32.mrf.mxu1  ;;  %v846_v16 = vpop.f32.mrf.mxu0 }
 0x247   : > { %v792_v40 = vsub.f32 %v790_v34, %v732_v11 }
 0x248   : > { %v1256_v0 = vpop.f32.mrf.mxu0  ;;  %v901_v17 = vpop.f32.mrf.mxu1 }
 0x249   : > { %v965_v19 = vsub.f32 %v846_v16, %v901_v17 }
 0x24a   : > { %v849_v20 = vpop.f32.mrf.mxu0  ;;  %v1262_v21 = vpop.f32.mrf.mxu1 }
 0x24b   : > { %v967_v22 = vadd.f32 %v965_v19, %v787_v18 }
 0x24c   : > { %v1257_v23 = vpop.f32.mrf.mxu0  ;;  %v904_v24 = vpop.f32.mrf.mxu1 }
 0x24d   : > { %969 = vst.msk [vmem:[%s435_s20] sm:$0xff] %vm471_vm1, %v967_v22  ;;  %v966_v27 = vsub.f32 %v849_v20, %v904_v24 }
 0x24e   : > { %v958_v28 = vpop.f32.mrf.mxu0  ;;  %v1263_v29 = vpop.f32.mrf.mxu1 }
 0x24f   : > { %v968_v30 = vadd.f32 %v966_v27, %v788_v26  ;;  %v971_v31 = vsub.f32 %v958_v28, %v846_v16 }
 0x250   : > { %v1268_v32 = vpop.f32.mrf.mxu0 }
 0x251   : > { %970 = vst.msk [vmem:[%s435_s20 + $0x8] sm:$0xff] %vm471_vm1, %v968_v30  ;;  %v973_v35 = vsub.f32 %v971_v31, %v901_v17 }
 0x252   : > { %v961_v36 = vpop.f32.mrf.mxu0 }
 0x253   : > { %v975_v37 = vadd.f32 %v973_v35, %v791_v33  ;;  %v972_v38 = vsub.f32 %v961_v36, %v849_v20 }
 0x254   : > { %v1269_v39 = vpop.f32.mrf.mxu0 }
 0x255   : > { %1188 = vst.msk [vmem:[%s435_s20 + $0x10] sm:$0xff] %vm471_vm1, %v975_v37  ;;  %v974_v41 = vsub.f32 %v972_v38, %v904_v24 }
 0x257   : > { %v976_v42 = vadd.f32 %v974_v41, %v792_v40 }
 0x259   : > { %1189 = vst.msk [vmem:[%s435_s20 + $0x18] sm:$0xff] %vm471_vm1, %v976_v42 }
 0x25a   : > { %1587 = shalt.err (!%p1584_p8)
}
 0x25b   : > { %s1588_s26 = scalar_lea.hbm %s2019_s9, 512  ;;  %s1592_s13 = scalar_lea.hbm %s2073_s8, 1024 }
 0x25c   : > { %p1589_p3 = scmp.ne.s32.totalorder %s2019_s9, %s1588_s26  ;;  %p1593_p2 = scmp.lt.s32.totalorder %s2019_s9, %s2073_s8 }
 0x25d   : > { %p1594_p10 = scmp.lt.s32.totalorder %s1592_s13, %s1588_s26 }
 0x25e   : > { %p1590_p7 = pnand %p1589_p3, %p2110_p5 }
 0x25f   : > { %p1595_p0 = por %p1594_p10, %p1593_p2 }
 0x260   : > { %p1591_p12 = pneg %p1590_p7 }
 0x262   : > { %p1596_p13 = pnand %p1595_p0, %p1591_p12 }
 0x264   : > { %1599 = shalt.err (!%p1596_p13)
}
 0x265   : > { %s1668_s6 = smov 128   ;;  %s1669_s24 = smov 8  }
 0x266   : > { %1294 = dma.vmem_to_hbm [thread:$0]  (%p2110_p5), %s2021_s3, 512, %s2019_s9, %s981_s15, %s1668_s6, %s1668_s6, %s1669_s24  }
 0x267 PF: > { %s1009_s10 = sand.u32 1, %s1642_s27   ;;  %p2111_p9 = scmp.ne.s32.totalorder %s2098_s23, 0 }
 0x268   : > { %p2112_p11 = scmp.ge.s32.totalorder %s1654_s30, 2  ;;  %s1010_s20 = scalar_lea.sflag [#allocation4], %s1009_s10 }
 0x26a   : > { %p1320_p1 = pnand %p2112_p11, %p2111_p9 }
 0x26c   : > { %p1321_p4 = pneg %p1320_p1 }
 0x26e   : > { %1637 = dma.done.wait (%p1321_p4), %s1010_s20, 512  }
 0x26f   : > { %1639 = vsyncadd (%p1321_p4), %s1010_s20, 4294966784  ;;  %s2113_s21 = sld [smem:[#allocation21_spill]]  ;;  %p26_p6 = scmp.ge.s32.totalorder %s1826_s18, 4  }
 0x270   : > { %s2114_s27 = smov %s1646_s28  ;;  %s2115_s28 = smov %s1650_s29 }
 0x271   : > { %s2117_s30 = smov %s1826_s18  ;;  %28 = sbr.rel (!%p26_p6) target bundleno = 16 (0x10), region = 133 }
 0x275   : > { %s2116_s29 = smov %s2113_s21 }
 0x276   :  { %1015 = vsyncpa [#allocation3], 1 }
 0x277   :  { %1017 = vsyncpa [#allocation3 + $0x1], 1 }
 0x278   :  { %1018 = vsyncpa [#allocation6], 1 }
 0x279   :  { %1020 = vsyncpa [#allocation6 + $0x1], 1 }
 0x27a   :  { %1021 = vsyncpa [#allocation9], 1 }
 0x27b   :  { %1022 = vsyncpa [#allocation12], 1 }
 0x27c   :  { %1023 = vsyncpa [#allocation4], 1 }
 0x27d   :  { %1025 = vsyncpa [#allocation4 + $0x1], 1 }

// kernel: tpu_custom_call.1
= control target key start
LH: loop header
LB: loop body
LE: loop exit
PB: predicated region body
PF: predicated region fallthrough
CT: control target
= control target key end

     0   :  { %s2065_s0 = inlined_call_operand.hbm [shape: bf16[2,2,16,16], index: 0, kind: input, shape index: {}]   ;;  %s2066_s1 = inlined_call_operand.hbm [shape: bf16[2,2,16,16], index: 1, kind: input, shape index: {}]   ;;  %s2067_s2 = inlined_call_operand.hbm [shape: bf16[16,16], index: 2, kind: input, shape index: {}]   ;;  %s2068_s3 = inlined_call_operand.hbm [shape: bf16[16,16], index: 3, kind: input, shape index: {}]   ;;  %s2069_s4 = inlined_call_operand.hbm [shape: bf16[16,16], index: 4, kind: input, shape index: {}]   ;;  %s2070_s5 = inlined_call_operand.vmem [shape: bf16[16,16], index: 5, kind: input, shape index: {}]   ;;  %s2071_s6 = inlined_call_operand.hbm [shape: bf16[16,16], index: 6, kind: input, shape index: {}]   ;;  %s2072_s7 = inlined_call_operand.hbm [shape: bf16[16,16], index: 7, kind: input, shape index: {}]   ;;  %s2073_s8 = inlined_call_operand.hbm [shape: f32[2,2,16,16], index: 8, kind: output, shape index: {}]  }
   0x1   :  { %2081 = sst [smem:[#allocation22_spill]] %s2065_s0 }
   0x2   :  { %2082 = sst [smem:[#allocation23_spill]] %s2067_s2 }
   0x3   :  { %2083 = sst [smem:[#allocation24_spill]] %s2068_s3 }
   0x4   :  { %2084 = sst [smem:[#allocation25_spill]] %s2069_s4 }
   0x5   :  { %2085 = sst [smem:[#allocation26_spill]] %s2071_s6 }
   0x6   :  { %2086 = sst [smem:[#allocation27_spill]] %s2072_s7 }
   0x7   :  { %13 = vsyncpa [#allocation3], 0 }
   0x8   :  { %15 = vsyncpa [#allocation3 + $0x1], 0 }
   0x9   :  { %16 = vsyncpa [#allocation6], 0 }
   0xa   :  { %18 = vsyncpa [#allocation6 + $0x1], 0 }
   0xb   :  { %19 = vsyncpa [#allocation9], 0 }
   0xc   :  { %20 = vsyncpa [#allocation12], 0 }
   0xd   :  { %21 = vsyncpa [#allocation4], 0 }
   0xe   :  { %23 = vsyncpa [#allocation4 + $0x1], 0  ;;  %s1715_s27 = smov 0   ;;  %s1717_s28 = smov 0  }
   0xf   :  { %s1719_s29 = smov 0   ;;  %s1721_s30 = smov 0  }
  0x10 LB: > { %s1656_s9 = smov [#allocation7]   ;;  %s1736_s11 = sadd.s32 4294967295, %s1654_s30   ;;  %s1654_s30 = sphi %s1721_s30, %s2117_s30   ;;  %s1650_s29 = sphi %s1719_s29, %s2116_s29   ;;  %s1646_s28 = sphi %s1717_s28, %s2115_s28   ;;  %s1642_s27 = sphi %s1715_s27, %s2114_s27  }
  0x11   : > { %s250_s10 = sshll.u32 %s1656_s9, 4  ;;  %p1138_p0 = scmp.ge.s32.totalorder %s1654_s30, 1  ;;  %s251_s10 = int_to_ptr.vmem [resolvable:$true] %s250_s10 }
  0x12   : > { %p2078_p1 = scmp.eq.s32.totalorder %s1736_s11, 0  ;;  %p238_p2 = scmp.lt.s32.totalorder %s1654_s30, 3 }
  0x13   : > { %s1657_s13 = smov [#allocation8]   ;;  %s1658_s16 = smov [#allocation11]  }
  0x14   : > { %p1741_p3 = pnand %p1138_p0, %p238_p2  ;;  %s263_s14 = sshll.u32 %s1657_s13, 4  ;;  %s1754_s14 = int_to_ptr.vmem [resolvable:$true] %s263_s14 }
  0x15   : > { %s292_s17 = sshll.u32 %s1658_s16, 4  ;;  %s1399_s19 = scalar_lea.vmem %s251_s10, 128  ;;  %s1756_s17 = int_to_ptr.vmem [resolvable:$true] %s292_s17 }
  0x16   : > { %p1296_p5 = pneg %p1741_p3  ;;  %p1400_p8 = scmp.ne.s32.totalorder %s251_s10, %s1399_s19 }
  0x17   : > { %p1407_p11 = scmp.lt.s32.totalorder %s251_s10, %s251_s10  ;;  %p1408_p12 = scmp.lt.s32.totalorder %s1399_s19, %s1399_s19 }
  0x18   : > { %p1750_p6 = pnand %p1296_p5, %p2078_p1 }
  0x19   : > { %p1409_p13 = por %p1408_p12, %p1407_p11 }
  0x1a   : > { %p1760_p7 = pneg %p1750_p6 }
  0x1c   : > { %p1402_p9 = pnand %p1400_p8, %p1760_p7 }
  0x1e   : > { %p1403_p10 = pneg %p1402_p9 }
  0x20   : > { %p1410_p0 = pnand %p1409_p13, %p1403_p10 }
  0x22   : > { %1413 = shalt.err (!%p1410_p0)
}
  0x23   : > { %s2074_s20 = smov 64   ;;  %s2076_s21 = smov 4  }
  0x24   : > { %s2090_s2 = sld [smem:[#allocation23_spill]]  ;;  %s1425_s24 = scalar_lea.vmem %s1754_s14, 128 }
  0x25   : > { %p1426_p2 = scmp.ne.s32.totalorder %s1754_s14, %s1425_s24  ;;  %p1433_p9 = scmp.lt.s32.totalorder %s1754_s14, %s1754_s14 }
  0x26   : > { %p1434_p10 = scmp.lt.s32.totalorder %s1425_s24, %s1425_s24 }
  0x27   : > { %p1428_p5 = pnand %p1426_p2, %p1760_p7 }
  0x28   : > { %p1435_p11 = por %p1434_p10, %p1433_p9 }
  0x29   : > { %p1429_p8 = pneg %p1428_p5 }
  0x2a   : > { %1299 = dma.hbm_to_vmem [thread:$0]  (!%p1750_p6), %s2090_s2, 128, %s251_s10, [#allocation6], %s2074_s20, %s2074_s20, %s2076_s21  }
  0x2b   : > { %p1436_p12 = pnand %p1435_p11, %p1429_p8 }
  0x2d   : > { %1439 = shalt.err (!%p1436_p12)
}
  0x2e   : > { %s2091_s3 = sld [smem:[#allocation24_spill]]  ;;  %s1451_s9 = scalar_lea.vmem %s1756_s17, 128 }
  0x2f   : > { %p1452_p13 = scmp.ne.s32.totalorder %s1756_s17, %s1451_s9  ;;  %p1459_p5 = scmp.lt.s32.totalorder %s1756_s17, %s1756_s17 }
  0x30   : > { %p1460_p8 = scmp.lt.s32.totalorder %s1451_s9, %s1451_s9 }
  0x31   : > { %p1454_p0 = pnand %p1452_p13, %p1760_p7 }
  0x32   : > { %p1461_p9 = por %p1460_p8, %p1459_p5 }
  0x33   : > { %p1455_p2 = pneg %p1454_p0 }
  0x34   : > { %1302 = dma.hbm_to_vmem [thread:$0]  (!%p1750_p6), %s2091_s3, 128, %s1754_s14, [#allocation9], %s2074_s20, %s2074_s20, %s2076_s21  }
  0x35   : > { %p1462_p10 = pnand %p1461_p9, %p1455_p2 }
  0x37   : > { %1465 = shalt.err (!%p1462_p10)
}
  0x38   : > { %s2092_s6 = sld [smem:[#allocation26_spill]]  ;;  %s1661_s14 = smov [#allocation10]  }
  0x39   : > { %s276_s16 = sshll.u32 %s1661_s14, 4  ;;  %s1662_s19 = smov [#allocation13]   ;;  %s277_s16 = int_to_ptr.vmem [resolvable:$true] %s276_s16 }
  0x3a   : > { %s305_s22 = sshll.u32 %s1662_s19, 4  ;;  %s1477_s23 = scalar_lea.vmem %s277_s16, 128  ;;  %s306_s22 = int_to_ptr.vmem [resolvable:$true] %s305_s22 }
  0x3b   : > { %p1478_p11 = scmp.ne.s32.totalorder %s277_s16, %s1477_s23  ;;  %p1485_p0 = scmp.lt.s32.totalorder %s277_s16, %s277_s16 }
  0x3c   : > { %p1486_p2 = scmp.lt.s32.totalorder %s1477_s23, %s1477_s23 }
  0x3d   : > { %p1480_p12 = pnand %p1478_p11, %p1760_p7 }
  0x3e   : > { %1308 = dma.hbm_to_vmem [thread:$0]  (!%p1750_p6), %s2092_s6, 128, %s1756_s17, [#allocation12], %s2074_s20, %s2074_s20, %s2076_s21  }
  0x3f   : > { %p1481_p13 = pneg %p1480_p12  ;;  %p1487_p5 = por %p1486_p2, %p1485_p0 }
  0x41   : > { %p1488_p8 = pnand %p1487_p5, %p1481_p13 }
  0x43   : > { %1491 = shalt.err (!%p1488_p8)
}
  0x44   : > { %s2093_s4 = sld [smem:[#allocation25_spill]]  ;;  %s1503_s25 = scalar_lea.vmem %s306_s22, 128 }
  0x45   : > { %p1504_p9 = scmp.ne.s32.totalorder %s306_s22, %s1503_s25  ;;  %p1511_p12 = scmp.lt.s32.totalorder %s306_s22, %s306_s22 }
  0x46   : > { %p1512_p0 = scmp.lt.s32.totalorder %s1503_s25, %s1503_s25 }
  0x47   : > { %p1506_p10 = pnand %p1504_p9, %p1760_p7 }
  0x48   : > { %p1513_p13 = por %p1512_p0, %p1511_p12 }
  0x49   : > { %p1507_p11 = pneg %p1506_p10 }
  0x4a   : > { %1305 = dma.hbm_to_vmem [thread:$0]  (!%p1750_p6), %s2093_s4, 128, %s277_s16, [#allocation9], %s2074_s20, %s2074_s20, %s2076_s21  }
  0x4b   : > { %p1514_p2 = pnand %p1513_p13, %p1507_p11 }
  0x4d   : > { %1517 = shalt.err (!%p1514_p2)
}
  0x4e   : > { %s2094_s7 = sld [smem:[#allocation27_spill]]  ;;  %s1137_s15 = sadd.s32 4294967294, %s1654_s30  }
  0x4f   : > { %s1826_s18 = sadd.s32 1, %s1654_s30   ;;  %s36_s10 = sadd.s32 1, %s1650_s29 }
  0x50   : > { %s33_s13 = ssub.s32 %s1654_s30, %s1826_s18  ;;  %p43_p7 = scmp.ne.s32.totalorder %s1650_s29, %s1646_s28 }
  0x51   : > { %p34_p5 = scmp.eq.s32.totalorder %s33_s13, 0  ;;  %p44_p8 = scmp.eq.s32.totalorder %s1654_s30, 0 }
  0x52   : > { %p49_p9 = scmp.ne.s32.totalorder %s1646_s28, %s1642_s27  ;;  %p225_p10 = scmp.eq.s32.totalorder %s1736_s11, 1 }
  0x53   : > { %s1838_s14 = scalar_select %p34_p5, %s1650_s29, %s36_s10  }
  0x54   : > { %1311 = dma.hbm_to_vmem [thread:$0]  (!%p1750_p6), %s2094_s7, 128, %s306_s22, [#allocation12], %s2074_s20, %s2074_s20, %s2076_s21  }
  0x55   : > { %2095 = sst [smem:[#allocation21_spill]] %s1838_s14  ;;  %p45_p11 = por %p44_p8, %p43_p7 }
  0x56   : > { %p1842_p12 = por %p2078_p1, %p49_p9  ;;  %p1846_p6 = por %p225_p10, %p43_p7 }
  0x57   : > { %p231_p0 = scmp.eq.s32.totalorder %s1137_s15, 1  ;;  %p1328_p13 = scmp.lt.s32.totalorder %s1654_s30, 2 }
  0x58   : > { %s2096_s16 = scalar_select %p1842_p12, 1, 0 }
  0x59   : > { %s2097_s19 = scalar_select %p1846_p6, 1, 0 }
  0x5a   : > { %s319_s22 = sand.u32 1, %s1650_s29   ;;  %p1852_p2 = por %p231_p0, %p49_p9 }
  0x5b   : > { %s1856_s17 = sshll.u32 %s319_s22, 4  ;;  %s1195_s24 = sshll.u32 %s1654_s30, 8 }
  0x5c   : > { %s2098_s23 = scalar_select %p1852_p2, 1, 0 }
  0x5d   : > { %s2099_s0 = sld [smem:[#allocation22_spill]]  ;;  %s323_s10 = scalar_lea.vmem [#allocation2], %s1856_s17 }
  0x5e   : > { %s330_s15 = sshll.u32 %s323_s10, 4  ;;  %p1865_p7 = pnand %p1328_p13, %p45_p11  ;;  %s1869_s15 = int_to_ptr.vmem [resolvable:$true] %s330_s15 }
  0x5f   : > { %s1874_s2 = scalar_lea.hbm %s2066_s1, %s1195_s24  ;;  %s1876_s25 = scalar_lea.sflag [#allocation3], %s319_s22 }
  0x60   : > { %p1520_p8 = pneg %p1865_p7 }
  0x63   : > { %s1862_s9 = scalar_lea.hbm %s2099_s0, %s1195_s24  ;;  %s1523_s4 = scalar_lea.hbm %s2099_s0, 512 }
  0x64   : > { %s1518_s26 = scalar_lea.hbm %s1862_s9, 256  ;;  %p1524_p11 = scmp.lt.s32.totalorder %s1862_s9, %s2099_s0 }
  0x65   : > { %p1519_p5 = scmp.ne.s32.totalorder %s1862_s9, %s1518_s26  ;;  %p1525_p0 = scmp.lt.s32.totalorder %s1523_s4, %s1518_s26 }
  0x67   : > { %p1521_p9 = pnand %p1520_p8, %p1519_p5  ;;  %p1526_p13 = por %p1525_p0, %p1524_p11 }
  0x69   : > { %p1522_p10 = pneg %p1521_p9 }
  0x6b   : > { %p1527_p4 = pnand %p1526_p13, %p1522_p10 }
  0x6d   : > { %1530 = shalt.err (!%p1527_p4)
}
  0x6e   : > { %s1531_s20 = scalar_lea.vmem %s1869_s15, 256  ;;  %s1663_s3 = smov [#allocation2]  }
  0x6f   : > { %p1532_p1 = scmp.ne.s32.totalorder %s1869_s15, %s1531_s20  ;;  %s1536_s21 = sshll.u32 %s1663_s3, 4  ;;  %s1537_s21 = int_to_ptr.vmem [resolvable:$false] %s1536_s21 }
  0x70   : > { %s1538_s22 = scalar_lea.vmem %s1537_s21, 512  ;;  %p1539_p2 = scmp.lt.s32.totalorder %s1869_s15, %s1537_s21 }
  0x71   : > { %p1534_p5 = pnand %p1532_p1, %p1520_p8  ;;  %p1540_p6 = scmp.lt.s32.totalorder %s1538_s22, %s1531_s20 }
  0x73   : > { %p1535_p9 = pneg %p1534_p5  ;;  %p1541_p12 = por %p1540_p6, %p1539_p2 }
  0x75   : > { %p1542_p11 = pnand %p1541_p12, %p1535_p9 }
  0x77   : > { %1545 = shalt.err (!%p1542_p11)
}
  0x78   : > { %s2101_s4 = smov 4   ;;  %s2102_s6 = smov 64  }
  0x79   : > { %1315 = dma.hbm_to_vmem [thread:$0]  (!%p1865_p7), %s1862_s9, 256, %s1869_s15, %s1876_s25, %s2102_s6, %s2102_s6, %s2101_s4  }
  0x7a   : > { %s344_s7 = scalar_lea.vmem [#allocation5], %s1856_s17  ;;  %s340_s26 = sand.u32 1, %s1654_s30  }
  0x7b   : > { %s351_s24 = sshll.u32 %s344_s7, 4  ;;  %s341_s10 = scalar_lea.sflag [#allocation6], %s340_s26  ;;  %s1908_s24 = int_to_ptr.vmem [resolvable:$true] %s351_s24 }
  0x7c   : > { %s1546_s20 = scalar_lea.hbm %s1874_s2, 256  ;;  %s1551_s22 = scalar_lea.hbm %s2066_s1, 512 }
  0x7d   : > { %p1547_p1 = scmp.ne.s32.totalorder %s1874_s2, %s1546_s20  ;;  %p1552_p6 = scmp.lt.s32.totalorder %s1874_s2, %s2066_s1 }
  0x7e   : > { %p1553_p2 = scmp.lt.s32.totalorder %s1551_s22, %s1546_s20 }
  0x7f   : > { %p1549_p4 = pnand %p1547_p1, %p1520_p8 }
  0x80   : > { %p1554_p10 = por %p1553_p2, %p1552_p6 }
  0x81   : > { %p1550_p12 = pneg %p1549_p4 }
  0x83   : > { %p1555_p0 = pnand %p1554_p10, %p1550_p12 }
  0x85   : > { %1558 = shalt.err (!%p1555_p0)
}
  0x86   : > { %s1559_s17 = scalar_lea.vmem %s1908_s24, 256  ;;  %s1664_s9 = smov [#allocation5]  }
  0x87   : > { %p1560_p13 = scmp.ne.s32.totalorder %s1908_s24, %s1559_s17  ;;  %s1564_s15 = sshll.u32 %s1664_s9, 4  ;;  %s1565_s15 = int_to_ptr.vmem [resolvable:$false] %s1564_s15 }
  0x88   : > { %s1566_s25 = scalar_lea.vmem %s1565_s15, 512  ;;  %p1567_p11 = scmp.lt.s32.totalorder %s1908_s24, %s1565_s15 }
  0x89   : > { %p1562_p5 = pnand %p1560_p13, %p1520_p8  ;;  %p1568_p1 = scmp.lt.s32.totalorder %s1566_s25, %s1559_s17 }
  0x8b   : > { %p1563_p9 = pneg %p1562_p5  ;;  %p1569_p4 = por %p1568_p1, %p1567_p11 }
  0x8d   : > { %p1570_p6 = pnand %p1569_p4, %p1563_p9 }
  0x8f   : > { %1573 = shalt.err (!%p1570_p6)
}
  0x90   : > { %1318 = dma.hbm_to_vmem [thread:$0]  (!%p1865_p7), %s1874_s2, 256, %s1908_s24, %s341_s10, %s2102_s6, %s2102_s6, %s2101_s4  }
  0x91   : > { %363 = sbr.rel (%p1741_p3) target bundleno = 615 (0x267), region = 52  ;;  %s1938_s0 = sand.u32 (!%p1741_p3), 1, %s1646_s28  }
  0x92   : > { %s1152_s14 = sshll.u32 (!%p1741_p3), %s1938_s0, 4  ;;  %s366_s7 = scalar_lea.sflag (!%p1741_p3), [#allocation3], %s1938_s0 }
  0x93   : > { %s1942_s26 = scalar_lea.vmem (!%p1741_p3), [#allocation2], %s1152_s14  ;;  %p2103_p8 = scmp.ne.s32.totalorder (!%p1741_p3), %s2096_s16, 0 }
  0x96   : > { %1617 = dma.done.wait (%p2103_p8), %s366_s7, 256  }
  0x97   : > { %1619 = vsyncadd (%p2103_p8), %s366_s7, 4294967040  ;;  %s374_s2 = sand.u32 1, %s1736_s11   ;;  %s378_s13 = scalar_lea.vmem [#allocation5], %s1152_s14 }
  0x98   : > { %s375_s12 = scalar_lea.sflag [#allocation6], %s374_s2 }
  0x99   : > { %1621 = dma.done.wait (%p2103_p8), %s375_s12, 256  }
  0x9a   : > { %1623 = vsyncadd (%p2103_p8), %s375_s12, 4294967040  ;;  %p2104_p3 = scmp.eq.s32.totalorder %s1736_s11, 0 }
  0x9c   : > { %1625 = dma.done.wait (%p2104_p3), [#allocation6], 128   ;;  %p2105_p7 = pmov %p2104_p3 }
  0x9d   : > { %p2106_p12 = pmov %p2104_p3 }
  0x9e   : > { %1627 = vsyncadd (%p2105_p7), [#allocation6], 4294967168 }
  0x9f   : > { %1629 = dma.done.wait (%p2106_p12), [#allocation9], 256   ;;  %p2107_p2 = pmov %p2104_p3 }
  0xa1   : > { %1631 = vsyncadd (%p2107_p2), [#allocation9], 4294967040  ;;  %p2108_p10 = pmov %p2107_p2 }
  0xa2   : > { %p2109_p0 = pmov %p2107_p2 }
  0xa3   : > { %1633 = dma.done.wait (%p2108_p10), [#allocation12], 256  }
  0xa4   : > { %1635 = vsyncadd (%p2109_p0), [#allocation12], 4294967040  ;;  %v1665_v0 = vmov 0.0   ;;  %vm1666_vm0 = vmmov 0   ;;  %v455_v1 = vld [vmem:[%s378_s13] sm:$0xf] }
  0xa5   : > { %1216 = vmatprep.subr.bf16.mxu0 %v1665_v0  ;;  %1222 = vmatprep.subr.bf16.mxu1 %v1665_v0  ;;  %v456_v2 = vld [vmem:[%s378_s13 + $0x4] sm:$0xf]  ;;  %v1160_v3 = vld [vmem:[%s378_s13 + $0x8] sm:$0xf]  ;;  %v1161_v5 = vld [vmem:[%s378_s13 + $0xc] sm:$0xf] }
  0xa6   : > { %1218 = vmatprep.mubr.msk.bf16.mxu0 %vm1666_vm0, %v1665_v0  ;;  %1224 = vmatprep.mubr.msk.bf16.mxu1 %vm1666_vm0, %v1665_v0  ;;  %v1163_v4 = vcombine.low %v455_v1, %v456_v2  ;;  %v571_v6 = vadd.bf16 %v1160_v3, %v455_v1  ;;  %v437_v7 = vld [vmem:[#allocation7] sm:$0xf]  ;;  %v438_v8 = vld [vmem:[#allocation7 + $0x4] sm:$0xf]  ;;  %v1166_v9 = vcombine.low %v1160_v3, %v1161_v5  ;;  %v439_v12 = vld [vmem:[#allocation8] sm:$0xf] }
  0xa7   : > { %v572_v10 = vadd.bf16 %v1161_v5, %v456_v2  ;;  %v1162_v11 = vcombine.low %v437_v7, %v438_v8  ;;  %v440_v13 = vld [vmem:[#allocation8 + $0x4] sm:$0xf]  ;;  %vm471_vm1 = vcmask 130048   ;;  %v441_v16 = vsub.bf16 %v437_v7, %v439_v12  ;;  %v443_v19 = vld [vmem:[#allocation10] sm:$0xf]  ;;  %s1159_s10 = sshll.u32 %s1938_s0, 5 }
  0xa8   : > { %1217 = vmatpush3.bf16.msra.mxu0 %v1163_v4  ;;  %v1165_v14 = vcombine.low %v439_v12, %v440_v13  ;;  %1223 = vmatpush3.bf16.msra.mxu1 %v1166_v9  ;;  %v442_v17 = vsub.bf16 %v438_v8, %v440_v13  ;;  %v444_v20 = vld [vmem:[#allocation10 + $0x4] sm:$0xf]  ;;  %v445_v22 = vld [vmem:[%s2070_s5] sm:$0xf]  ;;  %v446_v23 = vld [vmem:[%s2070_s5 + $0x4] sm:$0xf] }
  0xa9   : > { %v1169_v15 = vcombine.low %v571_v6, %v572_v10  ;;  %1228 = vmatprep.subr.bf16.mxu0 %v1665_v0  ;;  %1234 = vmatprep.subr.bf16.mxu1 %v1665_v0  ;;  %v1171_v21 = vcombine.low %v443_v19, %v444_v20  ;;  %v1173_v24 = vcombine.low %v445_v22, %v446_v23  ;;  %v449_v44 = vld [vmem:[#allocation11] sm:$0xf]  ;;  %v450_v45 = vld [vmem:[#allocation11 + $0x4] sm:$0xf]  ;;  %v451_v49 = vld [vmem:[#allocation13] sm:$0xf] }
  0xaa   : > { %v1168_v18 = vcombine.low %v441_v16, %v442_v17  ;;  %v447_v25 = vadd.bf16 %v445_v22, %v443_v19  ;;  %v448_v26 = vadd.bf16 %v446_v23, %v444_v20  ;;  %v452_v50 = vld [vmem:[#allocation13 + $0x4] sm:$0xf]  ;;  %v1180_v51 = vcombine.low %v449_v44, %v450_v45  ;;  %v793_v55 = vld [vmem:[%s1942_s26] sm:$0xf]  ;;  %v1177_v59 = vld [vmem:[%s1942_s26 + $0x8] sm:$0xf] }
  0xab   : > { %1219 = vmatmul.mubr.msk.bf16.vlgmr.msra.gmra.mxu0 %vm471_vm1, %v1162_v11  ;;  %1225 = vmatmul.mubr.msk.bf16.vlgmr.msra.gmra.mxu1 %vm471_vm1, %v1165_v14  ;;  %v1183_v53 = vcombine.low %v451_v49, %v452_v50  ;;  %v794_v56 = vld [vmem:[%s1942_s26 + $0x4] sm:$0xf]  ;;  %v453_v57 = vadd.bf16 %v451_v49, %v449_v44  ;;  %v454_v58 = vadd.bf16 %v452_v50, %v450_v45  ;;  %v1178_v60 = vld [vmem:[%s1942_s26 + $0xc] sm:$0xf]  ;;  %s435_s20 = scalar_lea.vmem [#allocation14], %s1159_s10  ;;  %s1197_s21 = sshll.u32 %s1736_s11, 9 }
  0xac   : > { %1229 = vmatpush3.bf16.msra.mxu0 %v1169_v15  ;;  %1230 = vmatprep.mubr.msk.bf16.mxu0 %vm1666_vm0, %v1665_v0  ;;  %v1175_v27 = vcombine.low %v447_v25, %v448_v26  ;;  %v1179_v61 = vcombine.low %v793_v55, %v794_v56  ;;  %v1182_v63 = vcombine.low %v1177_v59, %v1178_v60  ;;  %s994_s3 = sshll.u32 %s435_s20, 4  ;;  %s2019_s9 = scalar_lea.hbm %s2073_s8, %s1197_s21  ;;  %s2021_s3 = int_to_ptr.vmem [resolvable:$true] %s994_s3 }
  0xad   : > { %1236 = vmatprep.mubr.msk.bf16.mxu1 %vm1666_vm0, %v1665_v0  ;;  %1240 = vmatprep.subr.bf16.mxu0 %v1665_v0  ;;  %v1186_v62 = vcombine.low %v453_v57, %v454_v58  ;;  %v908_v1 = vadd.bf16 %v1177_v59, %v793_v55  ;;  %v909_v2 = vadd.bf16 %v1178_v60, %v794_v56  ;;  %s981_s15 = scalar_lea.sflag [#allocation4], %s1938_s0  ;;  %s1574_s11 = scalar_lea.vmem %s2021_s3, 512 }
  0xae   : > { %1235 = vmatpush3.bf16.msra.mxu1 %v1171_v21  ;;  %p1575_p13 = scmp.ne.s32.totalorder %s2021_s3, %s1574_s11  ;;  %p2110_p5 = scmp.ne.s32.totalorder %s2097_s19, 0 }
  0xaf   : > { %1246 = vmatprep.subr.bf16.mxu1 %v1665_v0  ;;  %v1185_v3 = vcombine.low %v908_v1, %v909_v2  ;;  %s1667_s25 = smov [#allocation14]  }
  0xb0   : > { %p1576_p9 = pnand %p1575_p13, %p2110_p5  ;;  %s1578_s14 = sshll.u32 %s1667_s25, 4  ;;  %s1579_s14 = int_to_ptr.vmem [resolvable:$false] %s1578_s14 }
  0xb1   : > { %s1580_s7 = scalar_lea.vmem %s1579_s14, 1024  ;;  %p1581_p1 = scmp.lt.s32.totalorder %s2021_s3, %s1579_s14 }
  0xb2   : > { %p1577_p11 = pneg %p1576_p9  ;;  %p1582_p4 = scmp.lt.s32.totalorder %s1580_s7, %s1574_s11 }
  0xb3   : > { %1231 = vmatmul.mubr.msk.bf16.vlgmr.msra.gmra.mxu0 %vm471_vm1, %v1168_v18 }
  0xb4   : > { %1242 = vmatprep.mubr.msk.bf16.mxu0 %vm1666_vm0, %v1665_v0  ;;  %1241 = vmatpush3.bf16.msra.mxu0 %v1173_v24  ;;  %p1583_p6 = por %p1582_p4, %p1581_p1 }
  0xb5   : > { %1252 = vmatprep.subr.bf16.mxu0 %v1665_v0 }
  0xb6   : > { %p1584_p8 = pnand %p1583_p6, %p1577_p11 }
 0x16b   : > { %v509_v28 = vpop.f32.mrf.mxu0  ;;  %v564_v29 = vpop.f32.mrf.mxu1 }
 0x16c   : > { %v628_v34 = vadd.f32 %v564_v29, %v509_v28 }
 0x16d   : > { %v1220_v30 = vpop.f32.mrf.mxu0  ;;  %v1226_v31 = vpop.f32.mrf.mxu1 }
 0x16f   : > { %v512_v32 = vpop.f32.mrf.mxu0  ;;  %v567_v33 = vpop.f32.mrf.mxu1 }
 0x170   : > { %v629_v35 = vadd.f32 %v567_v33, %v512_v32 }
 0x171   : > { %v1221_v36 = vpop.f32.mrf.mxu0  ;;  %v1227_v37 = vpop.f32.mrf.mxu1 }
 0x172   : > { %v630_v38 = vpack.c.bf16 %v629_v35, %v628_v34 }
 0x173   : > { %v621_v39 = vpop.f32.mrf.mxu0 }
 0x174   : > { %1237 = vmatmul.mubr.msk.bf16.vlgmr.msra.gmra.mxu1 %vm471_vm1, %v630_v38  ;;  %v631_v41 = vsub.f32 %v621_v39, %v509_v28 }
 0x175   : > { %v1232_v40 = vpop.f32.mrf.mxu0  ;;  %1247 = vmatpush3.bf16.msra.mxu1 %v1175_v27  ;;  %1248 = vmatprep.mubr.msk.bf16.mxu1 %vm1666_vm0, %v1665_v0 }
 0x176   : > { %1258 = vmatprep.subr.bf16.mxu1 %v1665_v0  ;;  %v633_v47 = vadd.f32 %v631_v41, %v564_v29 }
 0x177   : > { %v624_v42 = vpop.f32.mrf.mxu0 }
 0x178   : > { %v632_v43 = vsub.f32 %v624_v42, %v512_v32 }
 0x179   : > { %v1233_v46 = vpop.f32.mrf.mxu0 }
 0x17a   : > { %v634_v48 = vadd.f32 %v632_v43, %v567_v33 }
 0x17c   : > { %v635_v52 = vpack.c.bf16 %v634_v48, %v633_v47 }
 0x17e   : > { %v736_v54 = vadd.bf16 %v635_v52, %v630_v38  ;;  %1243 = vmatmul.mubr.msk.bf16.vlgmr.msra.gmra.mxu0 %vm471_vm1, %v635_v52 }
 0x17f   : > { %1253 = vmatpush3.bf16.msra.mxu0 %v1180_v51  ;;  %1254 = vmatprep.mubr.msk.bf16.mxu0 %vm1666_vm0, %v1665_v0 }
 0x180   : > { %1249 = vmatmul.mubr.msk.bf16.vlgmr.msra.gmra.mxu1 %vm471_vm1, %v736_v54  ;;  %1264 = vmatprep.subr.bf16.mxu0 %v1665_v0 }
 0x181   : > { %1259 = vmatpush3.bf16.msra.mxu1 %v1183_v53  ;;  %1260 = vmatprep.mubr.msk.bf16.mxu1 %vm1666_vm0, %v1665_v0 }
 0x186   : > { %1255 = vmatmul.mubr.msk.bf16.vlgmr.msra.gmra.mxu0 %vm471_vm1, %v1179_v61 }
 0x187   : > { %1265 = vmatpush3.bf16.msra.mxu0 %v1186_v62  ;;  %1266 = vmatprep.mubr.msk.bf16.mxu0 %vm1666_vm0, %v1665_v0 }
 0x188   : > { %1261 = vmatmul.mubr.msk.bf16.vlgmr.msra.gmra.mxu1 %vm471_vm1, %v1182_v63 }
 0x18e   : > { %1267 = vmatmul.mubr.msk.bf16.vlgmr.msra.gmra.mxu0 %vm471_vm1, %v1185_v3 }
 0x234   : > { %v679_v4 = vpop.f32.mrf.mxu1 }
 0x236   : > { %v1238_v5 = vpop.f32.mrf.mxu1 }
 0x238   : > { %v682_v6 = vpop.f32.mrf.mxu1 }
 0x23a   : > { %v1239_v7 = vpop.f32.mrf.mxu1 }
 0x23e   : > { %v729_v8 = vpop.f32.mrf.mxu0 }
 0x23f   : > { %v787_v18 = vsub.f32 %v679_v4, %v729_v8 }
 0x240   : > { %v1244_v9 = vpop.f32.mrf.mxu0  ;;  %v780_v10 = vpop.f32.mrf.mxu1 }
 0x241   : > { %v789_v25 = vsub.f32 %v780_v10, %v679_v4 }
 0x242   : > { %v732_v11 = vpop.f32.mrf.mxu0  ;;  %v1250_v12 = vpop.f32.mrf.mxu1 }
 0x243   : > { %v788_v26 = vsub.f32 %v682_v6, %v732_v11  ;;  %v791_v33 = vsub.f32 %v789_v25, %v729_v8 }
 0x244   : > { %v1245_v13 = vpop.f32.mrf.mxu0  ;;  %v783_v14 = vpop.f32.mrf.mxu1 }
 0x245   : > { %v790_v34 = vsub.f32 %v783_v14, %v682_v6 }
 0x246   : > { %v1251_v15 = vpop.f32.mrf.mxu1  ;;  %v846_v16 = vpop.f32.mrf.mxu0 }
 0x247   : > { %v792_v40 = vsub.f32 %v790_v34, %v732_v11 }
 0x248   : > { %v1256_v0 = vpop.f32.mrf.mxu0  ;;  %v901_v17 = vpop.f32.mrf.mxu1 }
 0x249   : > { %v965_v19 = vsub.f32 %v846_v16, %v901_v17 }
 0x24a   : > { %v849_v20 = vpop.f32.mrf.mxu0  ;;  %v1262_v21 = vpop.f32.mrf.mxu1 }
 0x24b   : > { %v967_v22 = vadd.f32 %v965_v19, %v787_v18 }
 0x24c   : > { %v1257_v23 = vpop.f32.mrf.mxu0  ;;  %v904_v24 = vpop.f32.mrf.mxu1 }
 0x24d   : > { %969 = vst.msk [vmem:[%s435_s20] sm:$0xff] %vm471_vm1, %v967_v22  ;;  %v966_v27 = vsub.f32 %v849_v20, %v904_v24 }
 0x24e   : > { %v958_v28 = vpop.f32.mrf.mxu0  ;;  %v1263_v29 = vpop.f32.mrf.mxu1 }
 0x24f   : > { %v968_v30 = vadd.f32 %v966_v27, %v788_v26  ;;  %v971_v31 = vsub.f32 %v958_v28, %v846_v16 }
 0x250   : > { %v1268_v32 = vpop.f32.mrf.mxu0 }
 0x251   : > { %970 = vst.msk [vmem:[%s435_s20 + $0x8] sm:$0xff] %vm471_vm1, %v968_v30  ;;  %v973_v35 = vsub.f32 %v971_v31, %v901_v17 }
 0x252   : > { %v961_v36 = vpop.f32.mrf.mxu0 }
 0x253   : > { %v975_v37 = vadd.f32 %v973_v35, %v791_v33  ;;  %v972_v38 = vsub.f32 %v961_v36, %v849_v20 }
 0x254   : > { %v1269_v39 = vpop.f32.mrf.mxu0 }
 0x255   : > { %1188 = vst.msk [vmem:[%s435_s20 + $0x10] sm:$0xff] %vm471_vm1, %v975_v37  ;;  %v974_v41 = vsub.f32 %v972_v38, %v904_v24 }
 0x257   : > { %v976_v42 = vadd.f32 %v974_v41, %v792_v40 }
 0x259   : > { %1189 = vst.msk [vmem:[%s435_s20 + $0x18] sm:$0xff] %vm471_vm1, %v976_v42 }
 0x25a   : > { %1587 = shalt.err (!%p1584_p8)
}
 0x25b   : > { %s1588_s26 = scalar_lea.hbm %s2019_s9, 512  ;;  %s1592_s13 = scalar_lea.hbm %s2073_s8, 1024 }
 0x25c   : > { %p1589_p3 = scmp.ne.s32.totalorder %s2019_s9, %s1588_s26  ;;  %p1593_p2 = scmp.lt.s32.totalorder %s2019_s9, %s2073_s8 }
 0x25d   : > { %p1594_p10 = scmp.lt.s32.totalorder %s1592_s13, %s1588_s26 }
 0x25e   : > { %p1590_p7 = pnand %p1589_p3, %p2110_p5 }
 0x25f   : > { %p1595_p0 = por %p1594_p10, %p1593_p2 }
 0x260   : > { %p1591_p12 = pneg %p1590_p7 }
 0x262   : > { %p1596_p13 = pnand %p1595_p0, %p1591_p12 }
 0x264   : > { %1599 = shalt.err (!%p1596_p13)
}
 0x265   : > { %s1668_s6 = smov 128   ;;  %s1669_s24 = smov 8  }
 0x266   : > { %1294 = dma.vmem_to_hbm [thread:$0]  (%p2110_p5), %s2021_s3, 512, %s2019_s9, %s981_s15, %s1668_s6, %s1668_s6, %s1669_s24  }
 0x267 PF: > { %s1009_s10 = sand.u32 1, %s1642_s27   ;;  %p2111_p9 = scmp.ne.s32.totalorder %s2098_s23, 0 }
 0x268   : > { %p2112_p11 = scmp.ge.s32.totalorder %s1654_s30, 2  ;;  %s1010_s20 = scalar_lea.sflag [#allocation4], %s1009_s10 }
 0x26a   : > { %p1320_p1 = pnand %p2112_p11, %p2111_p9 }
 0x26c   : > { %p1321_p4 = pneg %p1320_p1 }
 0x26e   : > { %1637 = dma.done.wait (%p1321_p4), %s1010_s20, 512  }
 0x26f   : > { %1639 = vsyncadd (%p1321_p4), %s1010_s20, 4294966784  ;;  %s2113_s21 = sld [smem:[#allocation21_spill]]  ;;  %p26_p6 = scmp.ge.s32.totalorder %s1826_s18, 4  }
 0x270   : > { %s2114_s27 = smov %s1646_s28  ;;  %s2115_s28 = smov %s1650_s29 }
 0x271   : > { %s2117_s30 = smov %s1826_s18  ;;  %28 = sbr.rel (!%p26_p6) target bundleno = 16 (0x10), region = 133 }
 0x275   : > { %s2116_s29 = smov %s2113_s21 }
 0x276   :  { %1015 = vsyncpa [#allocation3], 1 }
 0x277   :  { %1017 = vsyncpa [#allocation3 + $0x1], 1 }
 0x278   :  { %1018 = vsyncpa [#allocation6], 1 }
 0x279   :  { %1020 = vsyncpa [#allocation6 + $0x1], 1 }
 0x27a   :  { %1021 = vsyncpa [#allocation9], 1 }
 0x27b   :  { %1022 = vsyncpa [#allocation12], 1 }
 0x27c   :  { %1023 = vsyncpa [#allocation4], 1 }
 0x27d   :  { %1025 = vsyncpa [#allocation4 + $0x1], 1 }

</bundles_post_ra>
